<compile_context>
chip_gen: v6e
topology: v6e:2x2x1
jax: 0.10.0
libtpu: 0.0.40
codegen_flags: <defaults>
</compile_context>

<pallas_src>
import math
import numpy as np
import jax
import jax.numpy as jnp
from jax.experimental import pallas as pl
from jax.experimental.pallas import tpu as pltpu


# ----------------------------------------------------------------------------
# Fused encoder-level kernel (EncoderConvBlock + vector quantisation)
# ----------------------------------------------------------------------------

def _make_level_kernel(*, T_in, stride, down_t, depth, dilations, res_scale, halo):
    s = stride
    pad0 = s // 2                       # torch: filter_t = 2*s, pad_t = s//2
    K = 2 * s
    n_stage_refs = 6 * down_t
    H = halo

    def kernel(*refs):
        x_ref = refs[0]
        stage_refs = refs[1:1 + n_stage_refs]
        wf_ref = refs[1 + n_stage_refs]
        bf_ref = refs[2 + n_stage_refs]
        kT_ref = refs[3 + n_stage_refs]
        ksq_ref = refs[4 + n_stage_refs]
        oz_ref = refs[5 + n_stage_refs]
        oc_ref = refs[6 + n_stage_refs]
        buf = refs[7 + n_stage_refs]           # VMEM scratch (T1 + 2H, width)

        T_cur = T_in
        for j in range(down_t):
            wd, bd, w1, b1, w2, b2 = stage_refs[6 * j: 6 * j + 6]
            width = wd.shape[2]
            n_state = w1.shape[3]
            T_nxt = T_cur // s
            T_pad = T_cur + 2 * pad0

            # ---- strided Conv1d(cin -> width, kernel=2s, stride=s, pad=s//2)
            if j == 0:
                xp = x_ref[0]                          # input pre-padded (once per level)
            else:
                xp = buf[pl.ds(H - pad0, T_pad), :]    # zero halo == zero padding

            row = jax.lax.broadcasted_iota(jnp.int32, (T_nxt, T_pad), 0)
            col = jax.lax.broadcasted_iota(jnp.int32, (T_nxt, T_pad), 1)
            y = jnp.zeros((T_nxt, width), jnp.float32) + bd[...]
            for k in range(K):
                # tap_k[t] = x_pad[s*t + k], gathered via an exact 0/1 matmul (MXU)
                sel = (col == s * row + k).astype(jnp.float32)
                tap = jnp.dot(sel, xp, preferred_element_type=jnp.float32)
                y = y + jnp.dot(tap, wd[k], preferred_element_type=jnp.float32)

            # reset scratch (zero halo + rows left over from the longer
            # previous-stage activation), then park the new activation.
            buf[...] = jnp.zeros_like(buf)
            buf[pl.ds(H, T_nxt), :] = y

            # ---- depth x ResConv1DBlock: x + scale*Conv1(ReLU(Conv3_dil(ReLU(x))))
            for dblk in range(depth):
                d = dilations[dblk]
                x_res = buf[pl.ds(H, T_nxt), :]
                h = jnp.zeros((T_nxt, n_state), jnp.float32) + b1[dblk]
                for k in range(3):
                    # ReLU(pad(x)) == pad(ReLU(x)) for zero padding
                    xk = buf[pl.ds(H + (k - 1) * d, T_nxt), :]
                    h = h + jnp.dot(jnp.maximum(xk, 0.0), w1[dblk, k],
                                    preferred_element_type=jnp.float32)
                h = jnp.maximum(h, 0.0)
                yb = jnp.dot(h, w2[dblk], preferred_element_type=jnp.float32) + b2[dblk]
                buf[pl.ds(H, T_nxt), :] = x_res + res_scale * yb

            T_cur = T_nxt

        # ---- final Conv1d(width -> emb, kernel=3, stride=1, pad=1), no activation
        cout = wf_ref.shape[2]
        z = jnp.zeros((T_cur, cout), jnp.float32) + bf_ref[...]
        for k in range(3):
            z = z + jnp.dot(buf[pl.ds(H + (k - 1), T_cur), :], wf_ref[k],
                            preferred_element_type=jnp.float32)
        oz_ref[0] = z.astype(oz_ref.dtype)

        # ---- BottleneckBlock.quantise: argmin_j ||z_t - k_j||^2 (first index on ties)
        xk = jnp.dot(z, kT_ref[...], preferred_element_type=jnp.float32)   # (T, Kb)
        dist = jnp.sum(z * z, axis=-1, keepdims=True) - 2.0 * xk + ksq_ref[...]
        dmin = jnp.min(dist, axis=-1, keepdims=True)
        ids = jax.lax.broadcasted_iota(jnp.int32, dist.shape, 1).astype(jnp.float32)
        first_min = jnp.min(jnp.where(dist <= dmin, ids, jnp.float32(dist.shape[1])),
                            axis=-1, keepdims=True)
        oc_ref[0] = first_min.astype(jnp.int32)

    return kernel


def _replicated_spec(shape):
    rank = len(shape)
    return pl.BlockSpec(shape, lambda i, _r=rank: (0,) * _r)


def encoder_level_forward(x_btc, level_params, lc):
    """One fused EncoderConvBlock + VQ level.  x_btc: (B, T, Cin) channels-last.
    Returns z (B, T_out, emb) float32 and codes (B, T_out, 1) int32."""
    B, T_in, Cin = x_btc.shape
    s = lc["stride_t"]
    down_t = lc["down_t"]
    pad0 = s // 2
    assert T_in % (s ** down_t) == 0, "time length must divide stride_t**down_t"
    T1 = T_in // s
    T_out = T_in // (s ** down_t)
    width = lc["width"]
    emb = lc["output_emb_width"]
    halo = max([pad0, 1] + list(lc["dilations"]))

    # one cheap XLA pad per level (replaces per-res-block jnp.pad + im2col)
    x_pad = jnp.pad(x_btc, ((0, 0), (pad0, pad0), (0, 0)))

    in_arrays = [x_pad]
    in_specs = [pl.BlockSpec((1, T_in + 2 * pad0, Cin), lambda i: (i, 0, 0))]
    for st in level_params["stages"]:
        for name in ("wd", "bd", "w1", "b1", "w2", "b2"):
            a = st[name]
            in_arrays.append(a)
            in_specs.append(_replicated_spec(a.shape))
    for a in (level_params["wf"], level_params["bf"],
              level_params["kT"], level_params["ksq"]):
        in_arrays.append(a)
        in_specs.append(_replicated_spec(a.shape))

    kernel = _make_level_kernel(
        T_in=T_in, stride=s, down_t=down_t, depth=lc["depth"],
        dilations=lc["dilations"], res_scale=lc["res_scale_val"], halo=halo)

    z, codes = pl.pallas_call(
        kernel,
        out_shape=(jax.ShapeDtypeStruct((B, T_out, emb), jnp.float32),
                   jax.ShapeDtypeStruct((B, T_out, 1), jnp.int32)),
        grid=(B,),
        in_specs=in_specs,
        out_specs=(pl.BlockSpec((1, T_out, emb), lambda i: (i, 0, 0)),
                   pl.BlockSpec((1, T_out, 1), lambda i: (i, 0, 0))),
        scratch_shapes=[pltpu.VMEM((T1 + 2 * halo, width), jnp.float32)],
        compiler_params=pltpu.CompilerParams(dimension_semantics=("parallel",)),
    )(*in_arrays)
    return z, codes


def vqvae_forward(x_ncw, params, level_cfgs):
    """Pallas VQVAE.forward(x, compute_pred=False).
    Returns (codes, zs): codes[l] (B, T_l) int32 is the module's return value;
    zs[l] (B, emb, T_l) are the continuous encoder outputs (for validation)."""
    x = jnp.transpose(x_ncw, (0, 2, 1))              # NCW -> channels-last (B, T, C)
    codes, zs = [], []
    for lvl, lc in enumerate(level_cfgs):
        z, c = encoder_level_forward(x, params["levels"][lvl], lc)
        codes.append(c[:, :, 0])
        zs.append(jnp.transpose(z, (0, 2, 1)))       # back to NCW like torch
        x = z                                        # next level consumes continuous z
    return codes, zs


# ----------------------------------------------------------------------------
# Parameter init (deterministic; weights stored pre-laid-out for the kernels)
# ----------------------------------------------------------------------------

def _init_conv(key, cin, cout, k):
    """torch Conv1d init, stored pre-transposed as (K, Cin, Cout) / (1, Cout)."""
    k1, k2 = jax.random.split(key)
    bound = 1.0 / math.sqrt(cin * k)
    w = jax.random.uniform(k1, (k, cin, cout), jnp.float32, -bound, bound)
    b = jax.random.uniform(k2, (1, cout), jnp.float32, -bound, bound)
    return w, b


def init_vqvae_params(key, cfg):
    n_state = int(cfg["m_conv"] * cfg["width"])
    width, depth = cfg["width"], cfg["depth"]
    levels_params, level_cfgs = [], []
    for lvl in range(cfg["levels"]):
        down_t = cfg["downs_t"][lvl]
        stride_t = cfg["strides_t"][lvl]
        cin_lvl = cfg["input_emb_width"] if lvl == 0 else cfg["output_emb_width"]
        dilations = tuple(
            cfg["dilation_growth_rate"]
            ** (d if cfg["dilation_cycle"] is None else d % cfg["dilation_cycle"])
            for d in range(depth))
        res_scale_val = 1.0 if not cfg["res_scale"] else 1.0 / math.sqrt(depth)

        stages = []
        for j in range(down_t):
            key, kd = jax.random.split(key)
            cin = cin_lvl if j == 0 else width
            wd, bd = _init_conv(kd, cin, width, 2 * stride_t)
            w1s, b1s, w2s, b2s = [], [], [], []
            for _ in range(depth):
                key, k1, k2 = jax.random.split(key, 3)
                w1, b1 = _init_conv(k1, width, n_state, 3)
                w2, b2 = _init_conv(k2, n_state, width, 1)
                if cfg["zero_out"]:
                    w2, b2 = jnp.zeros_like(w2), jnp.zeros_like(b2)
                w1s.append(w1); b1s.append(b1); w2s.append(w2[0]); b2s.append(b2)
            stages.append(dict(wd=wd, bd=bd,
                               w1=jnp.stack(w1s), b1=jnp.stack(b1s),
                               w2=jnp.stack(w2s), b2=jnp.stack(b2s)))

        key, kf, kc = jax.random.split(key, 3)
        wf, bf = _init_conv(kf, width, cfg["output_emb_width"], 3)
        # codebook stored transposed (emb, k_bins); squared norms precomputed
        kT = 2.0 * jax.random.normal(kc, (cfg["output_emb_width"], cfg["k_bins"]),
                                     jnp.float32)
        ksq = jnp.sum(kT * kT, axis=0, keepdims=True)      # (1, k_bins)
        levels_params.append(dict(stages=stages, wf=wf, bf=bf, kT=kT, ksq=ksq))
        level_cfgs.append(dict(down_t=down_t, stride_t=stride_t, depth=depth,
                               width=width, n_state=n_state,
                               output_emb_width=cfg["output_emb_width"],
                               dilations=dilations, res_scale_val=res_scale_val))
    return dict(levels=levels_params), level_cfgs


# ----------------------------------------------------------------------------
# Pure-JAX reference (mirrors the PyTorch module, NCW layout)
# ----------------------------------------------------------------------------

def _conv1d_ref(x_nch, w_kio, b, stride=1, padding=0, dilation=1):
    w_oik = jnp.transpose(w_kio, (2, 1, 0))
    y = jax.lax.conv_general_dilated(
        x_nch, w_oik, window_strides=(stride,), padding=[(padding, padding)],
        rhs_dilation=(dilation,), dimension_numbers=("NCH", "OIH", "NCH"),
        precision=jax.lax.Precision.HIGHEST)
    return y + b.reshape(1, -1, 1)


def reference_vqvae_forward(x_ncw, params, level_cfgs):
    codes, zs = [], []
    x = x_ncw
    for lvl, lc in enumerate(level_cfgs):
        p = params["levels"][lvl]
        for j in range(lc["down_t"]):
            st = p["stages"][j]
            x = _conv1d_ref(x, st["wd"], st["bd"],
                            stride=lc["stride_t"], padding=lc["stride_t"] // 2)
            for d in range(lc["depth"]):
                dil = lc["dilations"][d]
                h = jax.nn.relu(x)
                h = _conv1d_ref(h, st["w1"][d], st["b1"][d], padding=dil, dilation=dil)
                h = jax.nn.relu(h)
                h = _conv1d_ref(h, st["w2"][d][None], st["b2"][d])
                x = x + lc["res_scale_val"] * h
        x = _conv1d_ref(x, p["wf"], p["bf"], padding=1)
        zs.append(x)
        kT = p["kT"]                                        # (emb, k_bins)
        xf = jnp.transpose(x, (0, 2, 1)).reshape(-1, kT.shape[0])
        dist = (jnp.sum(xf * xf, axis=-1, keepdims=True)
                - 2.0 * xf @ kT + jnp.sum(kT * kT, axis=0, keepdims=True))
        codes.append(jnp.argmin(dist, axis=-1).astype(jnp.int32)
                     .reshape(x.shape[0], x.shape[2]))
    return codes, zs


# ----------------------------------------------------------------------------

if __name__ == "__main__":
    cfg = dict(input_emb_width=4, output_emb_width=8, levels=1,
               downs_t=(2,), strides_t=(2,), width=32, depth=2, m_conv=1.0,
               dilation_growth_rate=3, dilation_cycle=None,
               zero_out=False, res_scale=False, k_bins=32)
    B, T = 2, 64

    key = jax.random.PRNGKey(0)
    kp, kx = jax.random.split(key)
    params, level_cfgs = init_vqvae_params(kp, cfg)
    x = jax.random.normal(kx, (B, cfg["input_emb_width"], T), dtype=jnp.float32)

    fwd = jax.jit(lambda xx, pp: vqvae_forward(xx, pp, level_cfgs))
    codes, zs = jax.block_until_ready(fwd(x, params))
    ref_codes, ref_zs = reference_vqvae_forward(x, params, level_cfgs)

    T_out = T // (cfg["strides_t"][0] ** cfg["downs_t"][0])
    assert codes[0].shape == (B, T_out), codes[0].shape
    assert codes[0].dtype == jnp.int32
    assert zs[0].shape == (B, cfg["output_emb_width"], T_out), zs[0].shape

    # continuous encoder output matches the reference
    for z, rz in zip(zs, ref_zs):
        np.testing.assert_allclose(np.asarray(z), np.asarray(rz), rtol=2e-2, atol=2e-2)

    # VQ codes: each chosen codebook entry must achieve (numerically) the minimum
    # reference distance.  (Exact index equality could flip on near-ties under
    # MXU matmul precision, so validate via distances instead.)
    for c, rz, lvl_p in zip(codes, ref_zs, params["levels"]):
        zf = np.asarray(rz, np.float64).transpose(0, 2, 1)          # (B, T, E)
        kb = np.asarray(lvl_p["kT"], np.float64).T                   # (Kb, E)
        dist = ((zf[:, :, None, :] - kb[None, None, :, :]) ** 2).sum(-1)
        idx = np.asarray(c).astype(np.int64)[..., None]
        chosen = np.take_along_axis(dist, idx, axis=-1)[..., 0]
        assert np.all(chosen <= dist.min(-1) + 0.5), "VQ codes not near-optimal"

    print("KERNEL_OK")
</pallas_src>

<mosaic_0001>
module attributes {stable_mosaic.version = 11 : i64} {
  func.func @kernel(%arg0: i32, %arg1: memref<1x66x4xf32, #tpu.memory_space<vmem>>, %arg2: memref<4x4x32xf32, #tpu.memory_space<vmem>>, %arg3: memref<1x32xf32, #tpu.memory_space<vmem>>, %arg4: memref<2x3x32x32xf32, #tpu.memory_space<vmem>>, %arg5: memref<2x1x32xf32, #tpu.memory_space<vmem>>, %arg6: memref<2x32x32xf32, #tpu.memory_space<vmem>>, %arg7: memref<2x1x32xf32, #tpu.memory_space<vmem>>, %arg8: memref<4x32x32xf32, #tpu.memory_space<vmem>>, %arg9: memref<1x32xf32, #tpu.memory_space<vmem>>, %arg10: memref<2x3x32x32xf32, #tpu.memory_space<vmem>>, %arg11: memref<2x1x32xf32, #tpu.memory_space<vmem>>, %arg12: memref<2x32x32xf32, #tpu.memory_space<vmem>>, %arg13: memref<2x1x32xf32, #tpu.memory_space<vmem>>, %arg14: memref<3x32x8xf32, #tpu.memory_space<vmem>>, %arg15: memref<1x8xf32, #tpu.memory_space<vmem>>, %arg16: memref<8x32xf32, #tpu.memory_space<vmem>>, %arg17: memref<1x32xf32, #tpu.memory_space<vmem>>, %arg18: memref<1x16x8xf32, #tpu.memory_space<vmem>>, %arg19: memref<1x16x1xi32, #tpu.memory_space<vmem>>, %arg20: memref<38x32xf32, #tpu.memory_space<vmem>>) attributes {dimension_semantics = [#tpu.dimension_semantics<parallel>], iteration_bounds = array<i64: 2>, scalar_prefetch = 0 : i64, scratch_operands = 1 : i64, tpu.core_type = #tpu.core_type<tc>, window_params = [{transform_indices = @transform_0, window_bounds = array<i64: 1, 66, 4>}, {pipeline_mode = #tpu.pipeline_mode<synchronous>, transform_indices = @transform_1, window_bounds = array<i64: 4, 4, 32>}, {pipeline_mode = #tpu.pipeline_mode<synchronous>, transform_indices = @transform_2, window_bounds = array<i64: 1, 32>}, {pipeline_mode = #tpu.pipeline_mode<synchronous>, transform_indices = @transform_3, window_bounds = array<i64: 2, 3, 32, 32>}, {pipeline_mode = #tpu.pipeline_mode<synchronous>, transform_indices = @transform_4, window_bounds = array<i64: 2, 1, 32>}, {pipeline_mode = #tpu.pipeline_mode<synchronous>, transform_indices = @transform_5, window_bounds = array<i64: 2, 32, 32>}, {pipeline_mode = #tpu.pipeline_mode<synchronous>, transform_indices = @transform_6, window_bounds = array<i64: 2, 1, 32>}, {pipeline_mode = #tpu.pipeline_mode<synchronous>, transform_indices = @transform_7, window_bounds = array<i64: 4, 32, 32>}, {pipeline_mode = #tpu.pipeline_mode<synchronous>, transform_indices = @transform_8, window_bounds = array<i64: 1, 32>}, {pipeline_mode = #tpu.pipeline_mode<synchronous>, transform_indices = @transform_9, window_bounds = array<i64: 2, 3, 32, 32>}, {pipeline_mode = #tpu.pipeline_mode<synchronous>, transform_indices = @transform_10, window_bounds = array<i64: 2, 1, 32>}, {pipeline_mode = #tpu.pipeline_mode<synchronous>, transform_indices = @transform_11, window_bounds = array<i64: 2, 32, 32>}, {pipeline_mode = #tpu.pipeline_mode<synchronous>, transform_indices = @transform_12, window_bounds = array<i64: 2, 1, 32>}, {pipeline_mode = #tpu.pipeline_mode<synchronous>, transform_indices = @transform_13, window_bounds = array<i64: 3, 32, 8>}, {pipeline_mode = #tpu.pipeline_mode<synchronous>, transform_indices = @transform_14, window_bounds = array<i64: 1, 8>}, {pipeline_mode = #tpu.pipeline_mode<synchronous>, transform_indices = @transform_15, window_bounds = array<i64: 8, 32>}, {pipeline_mode = #tpu.pipeline_mode<synchronous>, transform_indices = @transform_16, window_bounds = array<i64: 1, 32>}, {transform_indices = @transform_17, window_bounds = array<i64: 1, 16, 8>}, {transform_indices = @transform_18, window_bounds = array<i64: 1, 16, 1>}]} {
    %c0 = arith.constant 0 : index
    %c0_0 = arith.constant 0 : index
    %c0_1 = arith.constant 0 : index
    %0 = vector.load %arg1[%c0, %c0_0, %c0_1] : memref<1x66x4xf32, #tpu.memory_space<vmem>>, vector<1x66x4xf32>
    %1 = vector.shape_cast %0 : vector<1x66x4xf32> to vector<66x4xf32>
    %2 = tpu.iota {dimensions = array<i32: 0>} : vector<32x66xi32>
    %3 = tpu.iota {dimensions = array<i32: 1>} : vector<32x66xi32>
    %cst = arith.constant 0.000000e+00 : f32
    %4 = vector.broadcast %cst : f32 to vector<32x32xf32>
    %c0_2 = arith.constant 0 : index
    %c0_3 = arith.constant 0 : index
    %5 = vector.load %arg3[%c0_2, %c0_3] : memref<1x32xf32, #tpu.memory_space<vmem>>, vector<1x32xf32>
    %6 = vector.broadcast %5 : vector<1x32xf32> to vector<32x32xf32>
    %7 = arith.addf %4, %6 : vector<32x32xf32>
    %c2_i32 = arith.constant 2 : i32
    %8 = vector.broadcast %c2_i32 : i32 to vector<32x66xi32>
    %9 = arith.muli %8, %2 : vector<32x66xi32>
    %c0_i32 = arith.constant 0 : i32
    %10 = vector.broadcast %c0_i32 : i32 to vector<32x66xi32>
    %11 = arith.addi %9, %10 : vector<32x66xi32>
    %12 = arith.cmpi eq, %3, %11 : vector<32x66xi32>
    %13 = arith.extui %12 : vector<32x66xi1> to vector<32x66xi32>
    %14 = arith.sitofp %13 : vector<32x66xi32> to vector<32x66xf32>
    %cst_4 = arith.constant dense<0.000000e+00> : vector<32x4xf32>
    %15 = tpu.matmul %14, %1, %cst_4 {dimension_numbers = #tpu.dot_dimension_numbers<[1], [0], [0], [1], [0, 0, 1, 1], [], []>} : vector<32x66xf32>, vector<66x4xf32>, vector<32x4xf32> -> vector<32x4xf32>
    %c0_5 = arith.constant 0 : index
    %c0_6 = arith.constant 0 : index
    %c0_7 = arith.constant 0 : index
    %16 = vector.load %arg2[%c0_5, %c0_6, %c0_7] : memref<4x4x32xf32, #tpu.memory_space<vmem>>, vector<1x4x32xf32>
    %17 = vector.shape_cast %16 : vector<1x4x32xf32> to vector<4x32xf32>
    %cst_8 = arith.constant dense<0.000000e+00> : vector<32x32xf32>
    %18 = tpu.matmul %15, %17, %cst_8 {dimension_numbers = #tpu.dot_dimension_numbers<[1], [0], [0], [1], [0, 0, 1, 1], [], []>} : vector<32x4xf32>, vector<4x32xf32>, vector<32x32xf32> -> vector<32x32xf32>
    %19 = arith.addf %7, %18 : vector<32x32xf32>
    %c2_i32_9 = arith.constant 2 : i32
    %20 = vector.broadcast %c2_i32_9 : i32 to vector<32x66xi32>
    %21 = arith.muli %20, %2 : vector<32x66xi32>
    %c1_i32 = arith.constant 1 : i32
    %22 = vector.broadcast %c1_i32 : i32 to vector<32x66xi32>
    %23 = arith.addi %21, %22 : vector<32x66xi32>
    %24 = arith.cmpi eq, %3, %23 : vector<32x66xi32>
    %25 = arith.extui %24 : vector<32x66xi1> to vector<32x66xi32>
    %26 = arith.sitofp %25 : vector<32x66xi32> to vector<32x66xf32>
    %cst_10 = arith.constant dense<0.000000e+00> : vector<32x4xf32>
    %27 = tpu.matmul %26, %1, %cst_10 {dimension_numbers = #tpu.dot_dimension_numbers<[1], [0], [0], [1], [0, 0, 1, 1], [], []>} : vector<32x66xf32>, vector<66x4xf32>, vector<32x4xf32> -> vector<32x4xf32>
    %c1 = arith.constant 1 : index
    %c0_11 = arith.constant 0 : index
    %c0_12 = arith.constant 0 : index
    %28 = vector.load %arg2[%c1, %c0_11, %c0_12] : memref<4x4x32xf32, #tpu.memory_space<vmem>>, vector<1x4x32xf32>
    %29 = vector.shape_cast %28 : vector<1x4x32xf32> to vector<4x32xf32>
    %cst_13 = arith.constant dense<0.000000e+00> : vector<32x32xf32>
    %30 = tpu.matmul %27, %29, %cst_13 {dimension_numbers = #tpu.dot_dimension_numbers<[1], [0], [0], [1], [0, 0, 1, 1], [], []>} : vector<32x4xf32>, vector<4x32xf32>, vector<32x32xf32> -> vector<32x32xf32>
    %31 = arith.addf %19, %30 : vector<32x32xf32>
    %c2_i32_14 = arith.constant 2 : i32
    %32 = vector.broadcast %c2_i32_14 : i32 to vector<32x66xi32>
    %33 = arith.muli %32, %2 : vector<32x66xi32>
    %c2_i32_15 = arith.constant 2 : i32
    %34 = vector.broadcast %c2_i32_15 : i32 to vector<32x66xi32>
    %35 = arith.addi %33, %34 : vector<32x66xi32>
    %36 = arith.cmpi eq, %3, %35 : vector<32x66xi32>
    %37 = arith.extui %36 : vector<32x66xi1> to vector<32x66xi32>
    %38 = arith.sitofp %37 : vector<32x66xi32> to vector<32x66xf32>
    %cst_16 = arith.constant dense<0.000000e+00> : vector<32x4xf32>
    %39 = tpu.matmul %38, %1, %cst_16 {dimension_numbers = #tpu.dot_dimension_numbers<[1], [0], [0], [1], [0, 0, 1, 1], [], []>} : vector<32x66xf32>, vector<66x4xf32>, vector<32x4xf32> -> vector<32x4xf32>
    %c2 = arith.constant 2 : index
    %c0_17 = arith.constant 0 : index
    %c0_18 = arith.constant 0 : index
    %40 = vector.load %arg2[%c2, %c0_17, %c0_18] : memref<4x4x32xf32, #tpu.memory_space<vmem>>, vector<1x4x32xf32>
    %41 = vector.shape_cast %40 : vector<1x4x32xf32> to vector<4x32xf32>
    %cst_19 = arith.constant dense<0.000000e+00> : vector<32x32xf32>
    %42 = tpu.matmul %39, %41, %cst_19 {dimension_numbers = #tpu.dot_dimension_numbers<[1], [0], [0], [1], [0, 0, 1, 1], [], []>} : vector<32x4xf32>, vector<4x32xf32>, vector<32x32xf32> -> vector<32x32xf32>
    %43 = arith.addf %31, %42 : vector<32x32xf32>
    %c2_i32_20 = arith.constant 2 : i32
    %44 = vector.broadcast %c2_i32_20 : i32 to vector<32x66xi32>
    %45 = arith.muli %44, %2 : vector<32x66xi32>
    %c3_i32 = arith.constant 3 : i32
    %46 = vector.broadcast %c3_i32 : i32 to vector<32x66xi32>
    %47 = arith.addi %45, %46 : vector<32x66xi32>
    %48 = arith.cmpi eq, %3, %47 : vector<32x66xi32>
    %49 = arith.extui %48 : vector<32x66xi1> to vector<32x66xi32>
    %50 = arith.sitofp %49 : vector<32x66xi32> to vector<32x66xf32>
    %cst_21 = arith.constant dense<0.000000e+00> : vector<32x4xf32>
    %51 = tpu.matmul %50, %1, %cst_21 {dimension_numbers = #tpu.dot_dimension_numbers<[1], [0], [0], [1], [0, 0, 1, 1], [], []>} : vector<32x66xf32>, vector<66x4xf32>, vector<32x4xf32> -> vector<32x4xf32>
    %c3 = arith.constant 3 : index
    %c0_22 = arith.constant 0 : index
    %c0_23 = arith.constant 0 : index
    %52 = vector.load %arg2[%c3, %c0_22, %c0_23] : memref<4x4x32xf32, #tpu.memory_space<vmem>>, vector<1x4x32xf32>
    %53 = vector.shape_cast %52 : vector<1x4x32xf32> to vector<4x32xf32>
    %cst_24 = arith.constant dense<0.000000e+00> : vector<32x32xf32>
    %54 = tpu.matmul %51, %53, %cst_24 {dimension_numbers = #tpu.dot_dimension_numbers<[1], [0], [0], [1], [0, 0, 1, 1], [], []>} : vector<32x4xf32>, vector<4x32xf32>, vector<32x32xf32> -> vector<32x32xf32>
    %55 = arith.addf %43, %54 : vector<32x32xf32>
    %cst_25 = arith.constant 0.000000e+00 : f32
    %56 = vector.broadcast %cst_25 : f32 to vector<38x32xf32>
    %c0_26 = arith.constant 0 : index
    %c0_27 = arith.constant 0 : index
    %57 = vector.load %arg20[%c0_26, %c0_27] : memref<38x32xf32, #tpu.memory_space<vmem>>, vector<38x32xf32>
    tpu.vector_store %arg20[%c0_26, %c0_27], %56 {strides = array<i32>} : memref<38x32xf32, #tpu.memory_space<vmem>>, vector<38x32xf32>,
    %c3_28 = arith.constant 3 : index
    %c0_29 = arith.constant 0 : index
    %58 = vector.load %arg20[%c3_28, %c0_29] : memref<38x32xf32, #tpu.memory_space<vmem>>, vector<32x32xf32>
    tpu.vector_store %arg20[%c3_28, %c0_29], %55 {strides = array<i32>} : memref<38x32xf32, #tpu.memory_space<vmem>>, vector<32x32xf32>,
    %c3_30 = arith.constant 3 : index
    %c0_31 = arith.constant 0 : index
    %59 = vector.load %arg20[%c3_30, %c0_31] : memref<38x32xf32, #tpu.memory_space<vmem>>, vector<32x32xf32>
    %cst_32 = arith.constant 0.000000e+00 : f32
    %60 = vector.broadcast %cst_32 : f32 to vector<32x32xf32>
    %c0_33 = arith.constant 0 : index
    %c0_34 = arith.constant 0 : index
    %c0_35 = arith.constant 0 : index
    %61 = vector.load %arg5[%c0_33, %c0_34, %c0_35] : memref<2x1x32xf32, #tpu.memory_space<vmem>>, vector<1x1x32xf32>
    %62 = vector.shape_cast %61 : vector<1x1x32xf32> to vector<1x32xf32>
    %63 = vector.broadcast %62 : vector<1x32xf32> to vector<32x32xf32>
    %64 = arith.addf %60, %63 : vector<32x32xf32>
    %c2_36 = arith.constant 2 : index
    %c0_37 = arith.constant 0 : index
    %65 = vector.load %arg20[%c2_36, %c0_37] : memref<38x32xf32, #tpu.memory_space<vmem>>, vector<32x32xf32>
    %cst_38 = arith.constant 0.000000e+00 : f32
    %66 = vector.broadcast %cst_38 : f32 to vector<32x32xf32>
    %67 = arith.maximumf %65, %66 : vector<32x32xf32>
    %c0_39 = arith.constant 0 : index
    %c0_40 = arith.constant 0 : index
    %c0_41 = arith.constant 0 : index
    %c0_42 = arith.constant 0 : index
    %68 = vector.load %arg4[%c0_39, %c0_40, %c0_41, %c0_42] : memref<2x3x32x32xf32, #tpu.memory_space<vmem>>, vector<1x1x32x32xf32>
    %69 = vector.shape_cast %68 : vector<1x1x32x32xf32> to vector<32x32xf32>
    %cst_43 = arith.constant dense<0.000000e+00> : vector<32x32xf32>
    %70 = tpu.matmul %67, %69, %cst_43 {dimension_numbers = #tpu.dot_dimension_numbers<[1], [0], [0], [1], [0, 0, 1, 1], [], []>} : vector<32x32xf32>, vector<32x32xf32>, vector<32x32xf32> -> vector<32x32xf32>
    %71 = arith.addf %64, %70 : vector<32x32xf32>
    %c3_44 = arith.constant 3 : index
    %c0_45 = arith.constant 0 : index
    %72 = vector.load %arg20[%c3_44, %c0_45] : memref<38x32xf32, #tpu.memory_space<vmem>>, vector<32x32xf32>
    %cst_46 = arith.constant 0.000000e+00 : f32
    %73 = vector.broadcast %cst_46 : f32 to vector<32x32xf32>
    %74 = arith.maximumf %72, %73 : vector<32x32xf32>
    %c0_47 = arith.constant 0 : index
    %c1_48 = arith.constant 1 : index
    %c0_49 = arith.constant 0 : index
    %c0_50 = arith.constant 0 : index
    %75 = vector.load %arg4[%c0_47, %c1_48, %c0_49, %c0_50] : memref<2x3x32x32xf32, #tpu.memory_space<vmem>>, vector<1x1x32x32xf32>
    %76 = vector.shape_cast %75 : vector<1x1x32x32xf32> to vector<32x32xf32>
    %cst_51 = arith.constant dense<0.000000e+00> : vector<32x32xf32>
    %77 = tpu.matmul %74, %76, %cst_51 {dimension_numbers = #tpu.dot_dimension_numbers<[1], [0], [0], [1], [0, 0, 1, 1], [], []>} : vector<32x32xf32>, vector<32x32xf32>, vector<32x32xf32> -> vector<32x32xf32>
    %78 = arith.addf %71, %77 : vector<32x32xf32>
    %c4 = arith.constant 4 : index
    %c0_52 = arith.constant 0 : index
    %79 = vector.load %arg20[%c4, %c0_52] : memref<38x32xf32, #tpu.memory_space<vmem>>, vector<32x32xf32>
    %cst_53 = arith.constant 0.000000e+00 : f32
    %80 = vector.broadcast %cst_53 : f32 to vector<32x32xf32>
    %81 = arith.maximumf %79, %80 : vector<32x32xf32>
    %c0_54 = arith.constant 0 : index
    %c2_55 = arith.constant 2 : index
    %c0_56 = arith.constant 0 : index
    %c0_57 = arith.constant 0 : index
    %82 = vector.load %arg4[%c0_54, %c2_55, %c0_56, %c0_57] : memref<2x3x32x32xf32, #tpu.memory_space<vmem>>, vector<1x1x32x32xf32>
    %83 = vector.shape_cast %82 : vector<1x1x32x32xf32> to vector<32x32xf32>
    %cst_58 = arith.constant dense<0.000000e+00> : vector<32x32xf32>
    %84 = tpu.matmul %81, %83, %cst_58 {dimension_numbers = #tpu.dot_dimension_numbers<[1], [0], [0], [1], [0, 0, 1, 1], [], []>} : vector<32x32xf32>, vector<32x32xf32>, vector<32x32xf32> -> vector<32x32xf32>
    %85 = arith.addf %78, %84 : vector<32x32xf32>
    %cst_59 = arith.constant 0.000000e+00 : f32
    %86 = vector.broadcast %cst_59 : f32 to vector<32x32xf32>
    %87 = arith.maximumf %85, %86 : vector<32x32xf32>
    %c0_60 = arith.constant 0 : index
    %c0_61 = arith.constant 0 : index
    %c0_62 = arith.constant 0 : index
    %88 = vector.load %arg6[%c0_60, %c0_61, %c0_62] : memref<2x32x32xf32, #tpu.memory_space<vmem>>, vector<1x32x32xf32>
    %89 = vector.shape_cast %88 : vector<1x32x32xf32> to vector<32x32xf32>
    %cst_63 = arith.constant dense<0.000000e+00> : vector<32x32xf32>
    %90 = tpu.matmul %87, %89, %cst_63 {dimension_numbers = #tpu.dot_dimension_numbers<[1], [0], [0], [1], [0, 0, 1, 1], [], []>} : vector<32x32xf32>, vector<32x32xf32>, vector<32x32xf32> -> vector<32x32xf32>
    %c0_64 = arith.constant 0 : index
    %c0_65 = arith.constant 0 : index
    %c0_66 = arith.constant 0 : index
    %91 = vector.load %arg7[%c0_64, %c0_65, %c0_66] : memref<2x1x32xf32, #tpu.memory_space<vmem>>, vector<1x1x32xf32>
    %92 = vector.shape_cast %91 : vector<1x1x32xf32> to vector<1x32xf32>
    %93 = vector.broadcast %92 : vector<1x32xf32> to vector<32x32xf32>
    %94 = arith.addf %90, %93 : vector<32x32xf32>
    %cst_67 = arith.constant 1.000000e+00 : f32
    %95 = vector.broadcast %cst_67 : f32 to vector<32x32xf32>
    %96 = arith.mulf %95, %94 : vector<32x32xf32>
    %97 = arith.addf %59, %96 : vector<32x32xf32>
    %c3_68 = arith.constant 3 : index
    %c0_69 = arith.constant 0 : index
    %98 = vector.load %arg20[%c3_68, %c0_69] : memref<38x32xf32, #tpu.memory_space<vmem>>, vector<32x32xf32>
    tpu.vector_store %arg20[%c3_68, %c0_69], %97 {strides = array<i32>} : memref<38x32xf32, #tpu.memory_space<vmem>>, vector<32x32xf32>,
    %c3_70 = arith.constant 3 : index
    %c0_71 = arith.constant 0 : index
    %99 = vector.load %arg20[%c3_70, %c0_71] : memref<38x32xf32, #tpu.memory_space<vmem>>, vector<32x32xf32>
    %cst_72 = arith.constant 0.000000e+00 : f32
    %100 = vector.broadcast %cst_72 : f32 to vector<32x32xf32>
    %c1_73 = arith.constant 1 : index
    %c0_74 = arith.constant 0 : index
    %c0_75 = arith.constant 0 : index
    %101 = vector.load %arg5[%c1_73, %c0_74, %c0_75] : memref<2x1x32xf32, #tpu.memory_space<vmem>>, vector<1x1x32xf32>
    %102 = vector.shape_cast %101 : vector<1x1x32xf32> to vector<1x32xf32>
    %103 = vector.broadcast %102 : vector<1x32xf32> to vector<32x32xf32>
    %104 = arith.addf %100, %103 : vector<32x32xf32>
    %c0_76 = arith.constant 0 : index
    %c0_77 = arith.constant 0 : index
    %105 = vector.load %arg20[%c0_76, %c0_77] : memref<38x32xf32, #tpu.memory_space<vmem>>, vector<32x32xf32>
    %cst_78 = arith.constant 0.000000e+00 : f32
    %106 = vector.broadcast %cst_78 : f32 to vector<32x32xf32>
    %107 = arith.maximumf %105, %106 : vector<32x32xf32>
    %c1_79 = arith.constant 1 : index
    %c0_80 = arith.constant 0 : index
    %c0_81 = arith.constant 0 : index
    %c0_82 = arith.constant 0 : index
    %108 = vector.load %arg4[%c1_79, %c0_80, %c0_81, %c0_82] : memref<2x3x32x32xf32, #tpu.memory_space<vmem>>, vector<1x1x32x32xf32>
    %109 = vector.shape_cast %108 : vector<1x1x32x32xf32> to vector<32x32xf32>
    %cst_83 = arith.constant dense<0.000000e+00> : vector<32x32xf32>
    %110 = tpu.matmul %107, %109, %cst_83 {dimension_numbers = #tpu.dot_dimension_numbers<[1], [0], [0], [1], [0, 0, 1, 1], [], []>} : vector<32x32xf32>, vector<32x32xf32>, vector<32x32xf32> -> vector<32x32xf32>
    %111 = arith.addf %104, %110 : vector<32x32xf32>
    %c3_84 = arith.constant 3 : index
    %c0_85 = arith.constant 0 : index
    %112 = vector.load %arg20[%c3_84, %c0_85] : memref<38x32xf32, #tpu.memory_space<vmem>>, vector<32x32xf32>
    %cst_86 = arith.constant 0.000000e+00 : f32
    %113 = vector.broadcast %cst_86 : f32 to vector<32x32xf32>
    %114 = arith.maximumf %112, %113 : vector<32x32xf32>
    %c1_87 = arith.constant 1 : index
    %c1_88 = arith.constant 1 : index
    %c0_89 = arith.constant 0 : index
    %c0_90 = arith.constant 0 : index
    %115 = vector.load %arg4[%c1_87, %c1_88, %c0_89, %c0_90] : memref<2x3x32x32xf32, #tpu.memory_space<vmem>>, vector<1x1x32x32xf32>
    %116 = vector.shape_cast %115 : vector<1x1x32x32xf32> to vector<32x32xf32>
    %cst_91 = arith.constant dense<0.000000e+00> : vector<32x32xf32>
    %117 = tpu.matmul %114, %116, %cst_91 {dimension_numbers = #tpu.dot_dimension_numbers<[1], [0], [0], [1], [0, 0, 1, 1], [], []>} : vector<32x32xf32>, vector<32x32xf32>, vector<32x32xf32> -> vector<32x32xf32>
    %118 = arith.addf %111, %117 : vector<32x32xf32>
    %c6 = arith.constant 6 : index
    %c0_92 = arith.constant 0 : index
    %119 = vector.load %arg20[%c6, %c0_92] : memref<38x32xf32, #tpu.memory_space<vmem>>, vector<32x32xf32>
    %cst_93 = arith.constant 0.000000e+00 : f32
    %120 = vector.broadcast %cst_93 : f32 to vector<32x32xf32>
    %121 = arith.maximumf %119, %120 : vector<32x32xf32>
    %c1_94 = arith.constant 1 : index
    %c2_95 = arith.constant 2 : index
    %c0_96 = arith.constant 0 : index
    %c0_97 = arith.constant 0 : index
    %122 = vector.load %arg4[%c1_94, %c2_95, %c0_96, %c0_97] : memref<2x3x32x32xf32, #tpu.memory_space<vmem>>, vector<1x1x32x32xf32>
    %123 = vector.shape_cast %122 : vector<1x1x32x32xf32> to vector<32x32xf32>
    %cst_98 = arith.constant dense<0.000000e+00> : vector<32x32xf32>
    %124 = tpu.matmul %121, %123, %cst_98 {dimension_numbers = #tpu.dot_dimension_numbers<[1], [0], [0], [1], [0, 0, 1, 1], [], []>} : vector<32x32xf32>, vector<32x32xf32>, vector<32x32xf32> -> vector<32x32xf32>
    %125 = arith.addf %118, %124 : vector<32x32xf32>
    %cst_99 = arith.constant 0.000000e+00 : f32
    %126 = vector.broadcast %cst_99 : f32 to vector<32x32xf32>
    %127 = arith.maximumf %125, %126 : vector<32x32xf32>
    %c1_100 = arith.constant 1 : index
    %c0_101 = arith.constant 0 : index
    %c0_102 = arith.constant 0 : index
    %128 = vector.load %arg6[%c1_100, %c0_101, %c0_102] : memref<2x32x32xf32, #tpu.memory_space<vmem>>, vector<1x32x32xf32>
    %129 = vector.shape_cast %128 : vector<1x32x32xf32> to vector<32x32xf32>
    %cst_103 = arith.constant dense<0.000000e+00> : vector<32x32xf32>
    %130 = tpu.matmul %127, %129, %cst_103 {dimension_numbers = #tpu.dot_dimension_numbers<[1], [0], [0], [1], [0, 0, 1, 1], [], []>} : vector<32x32xf32>, vector<32x32xf32>, vector<32x32xf32> -> vector<32x32xf32>
    %c1_104 = arith.constant 1 : index
    %c0_105 = arith.constant 0 : index
    %c0_106 = arith.constant 0 : index
    %131 = vector.load %arg7[%c1_104, %c0_105, %c0_106] : memref<2x1x32xf32, #tpu.memory_space<vmem>>, vector<1x1x32xf32>
    %132 = vector.shape_cast %131 : vector<1x1x32xf32> to vector<1x32xf32>
    %133 = vector.broadcast %132 : vector<1x32xf32> to vector<32x32xf32>
    %134 = arith.addf %130, %133 : vector<32x32xf32>
    %cst_107 = arith.constant 1.000000e+00 : f32
    %135 = vector.broadcast %cst_107 : f32 to vector<32x32xf32>
    %136 = arith.mulf %135, %134 : vector<32x32xf32>
    %137 = arith.addf %99, %136 : vector<32x32xf32>
    %c3_108 = arith.constant 3 : index
    %c0_109 = arith.constant 0 : index
    %138 = vector.load %arg20[%c3_108, %c0_109] : memref<38x32xf32, #tpu.memory_space<vmem>>, vector<32x32xf32>
    tpu.vector_store %arg20[%c3_108, %c0_109], %137 {strides = array<i32>} : memref<38x32xf32, #tpu.memory_space<vmem>>, vector<32x32xf32>,
    %c2_110 = arith.constant 2 : index
    %c0_111 = arith.constant 0 : index
    %139 = vector.load %arg20[%c2_110, %c0_111] : memref<38x32xf32, #tpu.memory_space<vmem>>, vector<34x32xf32>
    %140 = tpu.iota {dimensions = array<i32: 0>} : vector<16x34xi32>
    %141 = tpu.iota {dimensions = array<i32: 1>} : vector<16x34xi32>
    %cst_112 = arith.constant 0.000000e+00 : f32
    %142 = vector.broadcast %cst_112 : f32 to vector<16x32xf32>
    %c0_113 = arith.constant 0 : index
    %c0_114 = arith.constant 0 : index
    %143 = vector.load %arg9[%c0_113, %c0_114] : memref<1x32xf32, #tpu.memory_space<vmem>>, vector<1x32xf32>
    %144 = vector.broadcast %143 : vector<1x32xf32> to vector<16x32xf32>
    %145 = arith.addf %142, %144 : vector<16x32xf32>
    %c2_i32_115 = arith.constant 2 : i32
    %146 = vector.broadcast %c2_i32_115 : i32 to vector<16x34xi32>
    %147 = arith.muli %146, %140 : vector<16x34xi32>
    %c0_i32_116 = arith.constant 0 : i32
    %148 = vector.broadcast %c0_i32_116 : i32 to vector<16x34xi32>
    %149 = arith.addi %147, %148 : vector<16x34xi32>
    %150 = arith.cmpi eq, %141, %149 : vector<16x34xi32>
    %151 = arith.extui %150 : vector<16x34xi1> to vector<16x34xi32>
    %152 = arith.sitofp %151 : vector<16x34xi32> to vector<16x34xf32>
    %cst_117 = arith.constant dense<0.000000e+00> : vector<16x32xf32>
    %153 = tpu.matmul %152, %139, %cst_117 {dimension_numbers = #tpu.dot_dimension_numbers<[1], [0], [0], [1], [0, 0, 1, 1], [], []>} : vector<16x34xf32>, vector<34x32xf32>, vector<16x32xf32> -> vector<16x32xf32>
    %c0_118 = arith.constant 0 : index
    %c0_119 = arith.constant 0 : index
    %c0_120 = arith.constant 0 : index
    %154 = vector.load %arg8[%c0_118, %c0_119, %c0_120] : memref<4x32x32xf32, #tpu.memory_space<vmem>>, vector<1x32x32xf32>
    %155 = vector.shape_cast %154 : vector<1x32x32xf32> to vector<32x32xf32>
    %cst_121 = arith.constant dense<0.000000e+00> : vector<16x32xf32>
    %156 = tpu.matmul %153, %155, %cst_121 {dimension_numbers = #tpu.dot_dimension_numbers<[1], [0], [0], [1], [0, 0, 1, 1], [], []>} : vector<16x32xf32>, vector<32x32xf32>, vector<16x32xf32> -> vector<16x32xf32>
    %157 = arith.addf %145, %156 : vector<16x32xf32>
    %c2_i32_122 = arith.constant 2 : i32
    %158 = vector.broadcast %c2_i32_122 : i32 to vector<16x34xi32>
    %159 = arith.muli %158, %140 : vector<16x34xi32>
    %c1_i32_123 = arith.constant 1 : i32
    %160 = vector.broadcast %c1_i32_123 : i32 to vector<16x34xi32>
    %161 = arith.addi %159, %160 : vector<16x34xi32>
    %162 = arith.cmpi eq, %141, %161 : vector<16x34xi32>
    %163 = arith.extui %162 : vector<16x34xi1> to vector<16x34xi32>
    %164 = arith.sitofp %163 : vector<16x34xi32> to vector<16x34xf32>
    %cst_124 = arith.constant dense<0.000000e+00> : vector<16x32xf32>
    %165 = tpu.matmul %164, %139, %cst_124 {dimension_numbers = #tpu.dot_dimension_numbers<[1], [0], [0], [1], [0, 0, 1, 1], [], []>} : vector<16x34xf32>, vector<34x32xf32>, vector<16x32xf32> -> vector<16x32xf32>
    %c1_125 = arith.constant 1 : index
    %c0_126 = arith.constant 0 : index
    %c0_127 = arith.constant 0 : index
    %166 = vector.load %arg8[%c1_125, %c0_126, %c0_127] : memref<4x32x32xf32, #tpu.memory_space<vmem>>, vector<1x32x32xf32>
    %167 = vector.shape_cast %166 : vector<1x32x32xf32> to vector<32x32xf32>
    %cst_128 = arith.constant dense<0.000000e+00> : vector<16x32xf32>
    %168 = tpu.matmul %165, %167, %cst_128 {dimension_numbers = #tpu.dot_dimension_numbers<[1], [0], [0], [1], [0, 0, 1, 1], [], []>} : vector<16x32xf32>, vector<32x32xf32>, vector<16x32xf32> -> vector<16x32xf32>
    %169 = arith.addf %157, %168 : vector<16x32xf32>
    %c2_i32_129 = arith.constant 2 : i32
    %170 = vector.broadcast %c2_i32_129 : i32 to vector<16x34xi32>
    %171 = arith.muli %170, %140 : vector<16x34xi32>
    %c2_i32_130 = arith.constant 2 : i32
    %172 = vector.broadcast %c2_i32_130 : i32 to vector<16x34xi32>
    %173 = arith.addi %171, %172 : vector<16x34xi32>
    %174 = arith.cmpi eq, %141, %173 : vector<16x34xi32>
    %175 = arith.extui %174 : vector<16x34xi1> to vector<16x34xi32>
    %176 = arith.sitofp %175 : vector<16x34xi32> to vector<16x34xf32>
    %cst_131 = arith.constant dense<0.000000e+00> : vector<16x32xf32>
    %177 = tpu.matmul %176, %139, %cst_131 {dimension_numbers = #tpu.dot_dimension_numbers<[1], [0], [0], [1], [0, 0, 1, 1], [], []>} : vector<16x34xf32>, vector<34x32xf32>, vector<16x32xf32> -> vector<16x32xf32>
    %c2_132 = arith.constant 2 : index
    %c0_133 = arith.constant 0 : index
    %c0_134 = arith.constant 0 : index
    %178 = vector.load %arg8[%c2_132, %c0_133, %c0_134] : memref<4x32x32xf32, #tpu.memory_space<vmem>>, vector<1x32x32xf32>
    %179 = vector.shape_cast %178 : vector<1x32x32xf32> to vector<32x32xf32>
    %cst_135 = arith.constant dense<0.000000e+00> : vector<16x32xf32>
    %180 = tpu.matmul %177, %179, %cst_135 {dimension_numbers = #tpu.dot_dimension_numbers<[1], [0], [0], [1], [0, 0, 1, 1], [], []>} : vector<16x32xf32>, vector<32x32xf32>, vector<16x32xf32> -> vector<16x32xf32>
    %181 = arith.addf %169, %180 : vector<16x32xf32>
    %c2_i32_136 = arith.constant 2 : i32
    %182 = vector.broadcast %c2_i32_136 : i32 to vector<16x34xi32>
    %183 = arith.muli %182, %140 : vector<16x34xi32>
    %c3_i32_137 = arith.constant 3 : i32
    %184 = vector.broadcast %c3_i32_137 : i32 to vector<16x34xi32>
    %185 = arith.addi %183, %184 : vector<16x34xi32>
    %186 = arith.cmpi eq, %141, %185 : vector<16x34xi32>
    %187 = arith.extui %186 : vector<16x34xi1> to vector<16x34xi32>
    %188 = arith.sitofp %187 : vector<16x34xi32> to vector<16x34xf32>
    %cst_138 = arith.constant dense<0.000000e+00> : vector<16x32xf32>
    %189 = tpu.matmul %188, %139, %cst_138 {dimension_numbers = #tpu.dot_dimension_numbers<[1], [0], [0], [1], [0, 0, 1, 1], [], []>} : vector<16x34xf32>, vector<34x32xf32>, vector<16x32xf32> -> vector<16x32xf32>
    %c3_139 = arith.constant 3 : index
    %c0_140 = arith.constant 0 : index
    %c0_141 = arith.constant 0 : index
    %190 = vector.load %arg8[%c3_139, %c0_140, %c0_141] : memref<4x32x32xf32, #tpu.memory_space<vmem>>, vector<1x32x32xf32>
    %191 = vector.shape_cast %190 : vector<1x32x32xf32> to vector<32x32xf32>
    %cst_142 = arith.constant dense<0.000000e+00> : vector<16x32xf32>
    %192 = tpu.matmul %189, %191, %cst_142 {dimension_numbers = #tpu.dot_dimension_numbers<[1], [0], [0], [1], [0, 0, 1, 1], [], []>} : vector<16x32xf32>, vector<32x32xf32>, vector<16x32xf32> -> vector<16x32xf32>
    %193 = arith.addf %181, %192 : vector<16x32xf32>
    %cst_143 = arith.constant 0.000000e+00 : f32
    %194 = vector.broadcast %cst_143 : f32 to vector<38x32xf32>
    %c0_144 = arith.constant 0 : index
    %c0_145 = arith.constant 0 : index
    %195 = vector.load %arg20[%c0_144, %c0_145] : memref<38x32xf32, #tpu.memory_space<vmem>>, vector<38x32xf32>
    tpu.vector_store %arg20[%c0_144, %c0_145], %194 {strides = array<i32>} : memref<38x32xf32, #tpu.memory_space<vmem>>, vector<38x32xf32>,
    %c3_146 = arith.constant 3 : index
    %c0_147 = arith.constant 0 : index
    %196 = vector.load %arg20[%c3_146, %c0_147] : memref<38x32xf32, #tpu.memory_space<vmem>>, vector<16x32xf32>
    tpu.vector_store %arg20[%c3_146, %c0_147], %193 {strides = array<i32>} : memref<38x32xf32, #tpu.memory_space<vmem>>, vector<16x32xf32>,
    %c3_148 = arith.constant 3 : index
    %c0_149 = arith.constant 0 : index
    %197 = vector.load %arg20[%c3_148, %c0_149] : memref<38x32xf32, #tpu.memory_space<vmem>>, vector<16x32xf32>
    %cst_150 = arith.constant 0.000000e+00 : f32
    %198 = vector.broadcast %cst_150 : f32 to vector<16x32xf32>
    %c0_151 = arith.constant 0 : index
    %c0_152 = arith.constant 0 : index
    %c0_153 = arith.constant 0 : index
    %199 = vector.load %arg11[%c0_151, %c0_152, %c0_153] : memref<2x1x32xf32, #tpu.memory_space<vmem>>, vector<1x1x32xf32>
    %200 = vector.shape_cast %199 : vector<1x1x32xf32> to vector<1x32xf32>
    %201 = vector.broadcast %200 : vector<1x32xf32> to vector<16x32xf32>
    %202 = arith.addf %198, %201 : vector<16x32xf32>
    %c2_154 = arith.constant 2 : index
    %c0_155 = arith.constant 0 : index
    %203 = vector.load %arg20[%c2_154, %c0_155] : memref<38x32xf32, #tpu.memory_space<vmem>>, vector<16x32xf32>
    %cst_156 = arith.constant 0.000000e+00 : f32
    %204 = vector.broadcast %cst_156 : f32 to vector<16x32xf32>
    %205 = arith.maximumf %203, %204 : vector<16x32xf32>
    %c0_157 = arith.constant 0 : index
    %c0_158 = arith.constant 0 : index
    %c0_159 = arith.constant 0 : index
    %c0_160 = arith.constant 0 : index
    %206 = vector.load %arg10[%c0_157, %c0_158, %c0_159, %c0_160] : memref<2x3x32x32xf32, #tpu.memory_space<vmem>>, vector<1x1x32x32xf32>
    %207 = vector.shape_cast %206 : vector<1x1x32x32xf32> to vector<32x32xf32>
    %cst_161 = arith.constant dense<0.000000e+00> : vector<16x32xf32>
    %208 = tpu.matmul %205, %207, %cst_161 {dimension_numbers = #tpu.dot_dimension_numbers<[1], [0], [0], [1], [0, 0, 1, 1], [], []>} : vector<16x32xf32>, vector<32x32xf32>, vector<16x32xf32> -> vector<16x32xf32>
    %209 = arith.addf %202, %208 : vector<16x32xf32>
    %c3_162 = arith.constant 3 : index
    %c0_163 = arith.constant 0 : index
    %210 = vector.load %arg20[%c3_162, %c0_163] : memref<38x32xf32, #tpu.memory_space<vmem>>, vector<16x32xf32>
    %cst_164 = arith.constant 0.000000e+00 : f32
    %211 = vector.broadcast %cst_164 : f32 to vector<16x32xf32>
    %212 = arith.maximumf %210, %211 : vector<16x32xf32>
    %c0_165 = arith.constant 0 : index
    %c1_166 = arith.constant 1 : index
    %c0_167 = arith.constant 0 : index
    %c0_168 = arith.constant 0 : index
    %213 = vector.load %arg10[%c0_165, %c1_166, %c0_167, %c0_168] : memref<2x3x32x32xf32, #tpu.memory_space<vmem>>, vector<1x1x32x32xf32>
    %214 = vector.shape_cast %213 : vector<1x1x32x32xf32> to vector<32x32xf32>
    %cst_169 = arith.constant dense<0.000000e+00> : vector<16x32xf32>
    %215 = tpu.matmul %212, %214, %cst_169 {dimension_numbers = #tpu.dot_dimension_numbers<[1], [0], [0], [1], [0, 0, 1, 1], [], []>} : vector<16x32xf32>, vector<32x32xf32>, vector<16x32xf32> -> vector<16x32xf32>
    %216 = arith.addf %209, %215 : vector<16x32xf32>
    %c4_170 = arith.constant 4 : index
    %c0_171 = arith.constant 0 : index
    %217 = vector.load %arg20[%c4_170, %c0_171] : memref<38x32xf32, #tpu.memory_space<vmem>>, vector<16x32xf32>
    %cst_172 = arith.constant 0.000000e+00 : f32
    %218 = vector.broadcast %cst_172 : f32 to vector<16x32xf32>
    %219 = arith.maximumf %217, %218 : vector<16x32xf32>
    %c0_173 = arith.constant 0 : index
    %c2_174 = arith.constant 2 : index
    %c0_175 = arith.constant 0 : index
    %c0_176 = arith.constant 0 : index
    %220 = vector.load %arg10[%c0_173, %c2_174, %c0_175, %c0_176] : memref<2x3x32x32xf32, #tpu.memory_space<vmem>>, vector<1x1x32x32xf32>
    %221 = vector.shape_cast %220 : vector<1x1x32x32xf32> to vector<32x32xf32>
    %cst_177 = arith.constant dense<0.000000e+00> : vector<16x32xf32>
    %222 = tpu.matmul %219, %221, %cst_177 {dimension_numbers = #tpu.dot_dimension_numbers<[1], [0], [0], [1], [0, 0, 1, 1], [], []>} : vector<16x32xf32>, vector<32x32xf32>, vector<16x32xf32> -> vector<16x32xf32>
    %223 = arith.addf %216, %222 : vector<16x32xf32>
    %cst_178 = arith.constant 0.000000e+00 : f32
    %224 = vector.broadcast %cst_178 : f32 to vector<16x32xf32>
    %225 = arith.maximumf %223, %224 : vector<16x32xf32>
    %c0_179 = arith.constant 0 : index
    %c0_180 = arith.constant 0 : index
    %c0_181 = arith.constant 0 : index
    %226 = vector.load %arg12[%c0_179, %c0_180, %c0_181] : memref<2x32x32xf32, #tpu.memory_space<vmem>>, vector<1x32x32xf32>
    %227 = vector.shape_cast %226 : vector<1x32x32xf32> to vector<32x32xf32>
    %cst_182 = arith.constant dense<0.000000e+00> : vector<16x32xf32>
    %228 = tpu.matmul %225, %227, %cst_182 {dimension_numbers = #tpu.dot_dimension_numbers<[1], [0], [0], [1], [0, 0, 1, 1], [], []>} : vector<16x32xf32>, vector<32x32xf32>, vector<16x32xf32> -> vector<16x32xf32>
    %c0_183 = arith.constant 0 : index
    %c0_184 = arith.constant 0 : index
    %c0_185 = arith.constant 0 : index
    %229 = vector.load %arg13[%c0_183, %c0_184, %c0_185] : memref<2x1x32xf32, #tpu.memory_space<vmem>>, vector<1x1x32xf32>
    %230 = vector.shape_cast %229 : vector<1x1x32xf32> to vector<1x32xf32>
    %231 = vector.broadcast %230 : vector<1x32xf32> to vector<16x32xf32>
    %232 = arith.addf %228, %231 : vector<16x32xf32>
    %cst_186 = arith.constant 1.000000e+00 : f32
    %233 = vector.broadcast %cst_186 : f32 to vector<16x32xf32>
    %234 = arith.mulf %233, %232 : vector<16x32xf32>
    %235 = arith.addf %197, %234 : vector<16x32xf32>
    %c3_187 = arith.constant 3 : index
    %c0_188 = arith.constant 0 : index
    %236 = vector.load %arg20[%c3_187, %c0_188] : memref<38x32xf32, #tpu.memory_space<vmem>>, vector<16x32xf32>
    tpu.vector_store %arg20[%c3_187, %c0_188], %235 {strides = array<i32>} : memref<38x32xf32, #tpu.memory_space<vmem>>, vector<16x32xf32>,
    %c3_189 = arith.constant 3 : index
    %c0_190 = arith.constant 0 : index
    %237 = vector.load %arg20[%c3_189, %c0_190] : memref<38x32xf32, #tpu.memory_space<vmem>>, vector<16x32xf32>
    %cst_191 = arith.constant 0.000000e+00 : f32
    %238 = vector.broadcast %cst_191 : f32 to vector<16x32xf32>
    %c1_192 = arith.constant 1 : index
    %c0_193 = arith.constant 0 : index
    %c0_194 = arith.constant 0 : index
    %239 = vector.load %arg11[%c1_192, %c0_193, %c0_194] : memref<2x1x32xf32, #tpu.memory_space<vmem>>, vector<1x1x32xf32>
    %240 = vector.shape_cast %239 : vector<1x1x32xf32> to vector<1x32xf32>
    %241 = vector.broadcast %240 : vector<1x32xf32> to vector<16x32xf32>
    %242 = arith.addf %238, %241 : vector<16x32xf32>
    %c0_195 = arith.constant 0 : index
    %c0_196 = arith.constant 0 : index
    %243 = vector.load %arg20[%c0_195, %c0_196] : memref<38x32xf32, #tpu.memory_space<vmem>>, vector<16x32xf32>
    %cst_197 = arith.constant 0.000000e+00 : f32
    %244 = vector.broadcast %cst_197 : f32 to vector<16x32xf32>
    %245 = arith.maximumf %243, %244 : vector<16x32xf32>
    %c1_198 = arith.constant 1 : index
    %c0_199 = arith.constant 0 : index
    %c0_200 = arith.constant 0 : index
    %c0_201 = arith.constant 0 : index
    %246 = vector.load %arg10[%c1_198, %c0_199, %c0_200, %c0_201] : memref<2x3x32x32xf32, #tpu.memory_space<vmem>>, vector<1x1x32x32xf32>
    %247 = vector.shape_cast %246 : vector<1x1x32x32xf32> to vector<32x32xf32>
    %cst_202 = arith.constant dense<0.000000e+00> : vector<16x32xf32>
    %248 = tpu.matmul %245, %247, %cst_202 {dimension_numbers = #tpu.dot_dimension_numbers<[1], [0], [0], [1], [0, 0, 1, 1], [], []>} : vector<16x32xf32>, vector<32x32xf32>, vector<16x32xf32> -> vector<16x32xf32>
    %249 = arith.addf %242, %248 : vector<16x32xf32>
    %c3_203 = arith.constant 3 : index
    %c0_204 = arith.constant 0 : index
    %250 = vector.load %arg20[%c3_203, %c0_204] : memref<38x32xf32, #tpu.memory_space<vmem>>, vector<16x32xf32>
    %cst_205 = arith.constant 0.000000e+00 : f32
    %251 = vector.broadcast %cst_205 : f32 to vector<16x32xf32>
    %252 = arith.maximumf %250, %251 : vector<16x32xf32>
    %c1_206 = arith.constant 1 : index
    %c1_207 = arith.constant 1 : index
    %c0_208 = arith.constant 0 : index
    %c0_209 = arith.constant 0 : index
    %253 = vector.load %arg10[%c1_206, %c1_207, %c0_208, %c0_209] : memref<2x3x32x32xf32, #tpu.memory_space<vmem>>, vector<1x1x32x32xf32>
    %254 = vector.shape_cast %253 : vector<1x1x32x32xf32> to vector<32x32xf32>
    %cst_210 = arith.constant dense<0.000000e+00> : vector<16x32xf32>
    %255 = tpu.matmul %252, %254, %cst_210 {dimension_numbers = #tpu.dot_dimension_numbers<[1], [0], [0], [1], [0, 0, 1, 1], [], []>} : vector<16x32xf32>, vector<32x32xf32>, vector<16x32xf32> -> vector<16x32xf32>
    %256 = arith.addf %249, %255 : vector<16x32xf32>
    %c6_211 = arith.constant 6 : index
    %c0_212 = arith.constant 0 : index
    %257 = vector.load %arg20[%c6_211, %c0_212] : memref<38x32xf32, #tpu.memory_space<vmem>>, vector<16x32xf32>
    %cst_213 = arith.constant 0.000000e+00 : f32
    %258 = vector.broadcast %cst_213 : f32 to vector<16x32xf32>
    %259 = arith.maximumf %257, %258 : vector<16x32xf32>
    %c1_214 = arith.constant 1 : index
    %c2_215 = arith.constant 2 : index
    %c0_216 = arith.constant 0 : index
    %c0_217 = arith.constant 0 : index
    %260 = vector.load %arg10[%c1_214, %c2_215, %c0_216, %c0_217] : memref<2x3x32x32xf32, #tpu.memory_space<vmem>>, vector<1x1x32x32xf32>
    %261 = vector.shape_cast %260 : vector<1x1x32x32xf32> to vector<32x32xf32>
    %cst_218 = arith.constant dense<0.000000e+00> : vector<16x32xf32>
    %262 = tpu.matmul %259, %261, %cst_218 {dimension_numbers = #tpu.dot_dimension_numbers<[1], [0], [0], [1], [0, 0, 1, 1], [], []>} : vector<16x32xf32>, vector<32x32xf32>, vector<16x32xf32> -> vector<16x32xf32>
    %263 = arith.addf %256, %262 : vector<16x32xf32>
    %cst_219 = arith.constant 0.000000e+00 : f32
    %264 = vector.broadcast %cst_219 : f32 to vector<16x32xf32>
    %265 = arith.maximumf %263, %264 : vector<16x32xf32>
    %c1_220 = arith.constant 1 : index
    %c0_221 = arith.constant 0 : index
    %c0_222 = arith.constant 0 : index
    %266 = vector.load %arg12[%c1_220, %c0_221, %c0_222] : memref<2x32x32xf32, #tpu.memory_space<vmem>>, vector<1x32x32xf32>
    %267 = vector.shape_cast %266 : vector<1x32x32xf32> to vector<32x32xf32>
    %cst_223 = arith.constant dense<0.000000e+00> : vector<16x32xf32>
    %268 = tpu.matmul %265, %267, %cst_223 {dimension_numbers = #tpu.dot_dimension_numbers<[1], [0], [0], [1], [0, 0, 1, 1], [], []>} : vector<16x32xf32>, vector<32x32xf32>, vector<16x32xf32> -> vector<16x32xf32>
    %c1_224 = arith.constant 1 : index
    %c0_225 = arith.constant 0 : index
    %c0_226 = arith.constant 0 : index
    %269 = vector.load %arg13[%c1_224, %c0_225, %c0_226] : memref<2x1x32xf32, #tpu.memory_space<vmem>>, vector<1x1x32xf32>
    %270 = vector.shape_cast %269 : vector<1x1x32xf32> to vector<1x32xf32>
    %271 = vector.broadcast %270 : vector<1x32xf32> to vector<16x32xf32>
    %272 = arith.addf %268, %271 : vector<16x32xf32>
    %cst_227 = arith.constant 1.000000e+00 : f32
    %273 = vector.broadcast %cst_227 : f32 to vector<16x32xf32>
    %274 = arith.mulf %273, %272 : vector<16x32xf32>
    %275 = arith.addf %237, %274 : vector<16x32xf32>
    %c3_228 = arith.constant 3 : index
    %c0_229 = arith.constant 0 : index
    %276 = vector.load %arg20[%c3_228, %c0_229] : memref<38x32xf32, #tpu.memory_space<vmem>>, vector<16x32xf32>
    tpu.vector_store %arg20[%c3_228, %c0_229], %275 {strides = array<i32>} : memref<38x32xf32, #tpu.memory_space<vmem>>, vector<16x32xf32>,
    %cst_230 = arith.constant 0.000000e+00 : f32
    %277 = vector.broadcast %cst_230 : f32 to vector<16x8xf32>
    %c0_231 = arith.constant 0 : index
    %c0_232 = arith.constant 0 : index
    %278 = vector.load %arg15[%c0_231, %c0_232] : memref<1x8xf32, #tpu.memory_space<vmem>>, vector<1x8xf32>
    %279 = vector.broadcast %278 : vector<1x8xf32> to vector<16x8xf32>
    %280 = arith.addf %277, %279 : vector<16x8xf32>
    %c2_233 = arith.constant 2 : index
    %c0_234 = arith.constant 0 : index
    %281 = vector.load %arg20[%c2_233, %c0_234] : memref<38x32xf32, #tpu.memory_space<vmem>>, vector<16x32xf32>
    %c0_235 = arith.constant 0 : index
    %c0_236 = arith.constant 0 : index
    %c0_237 = arith.constant 0 : index
    %282 = vector.load %arg14[%c0_235, %c0_236, %c0_237] : memref<3x32x8xf32, #tpu.memory_space<vmem>>, vector<1x32x8xf32>
    %283 = vector.shape_cast %282 : vector<1x32x8xf32> to vector<32x8xf32>
    %cst_238 = arith.constant dense<0.000000e+00> : vector<16x8xf32>
    %284 = tpu.matmul %281, %283, %cst_238 {dimension_numbers = #tpu.dot_dimension_numbers<[1], [0], [0], [1], [0, 0, 1, 1], [], []>} : vector<16x32xf32>, vector<32x8xf32>, vector<16x8xf32> -> vector<16x8xf32>
    %285 = arith.addf %280, %284 : vector<16x8xf32>
    %c3_239 = arith.constant 3 : index
    %c0_240 = arith.constant 0 : index
    %286 = vector.load %arg20[%c3_239, %c0_240] : memref<38x32xf32, #tpu.memory_space<vmem>>, vector<16x32xf32>
    %c1_241 = arith.constant 1 : index
    %c0_242 = arith.constant 0 : index
    %c0_243 = arith.constant 0 : index
    %287 = vector.load %arg14[%c1_241, %c0_242, %c0_243] : memref<3x32x8xf32, #tpu.memory_space<vmem>>, vector<1x32x8xf32>
    %288 = vector.shape_cast %287 : vector<1x32x8xf32> to vector<32x8xf32>
    %cst_244 = arith.constant dense<0.000000e+00> : vector<16x8xf32>
    %289 = tpu.matmul %286, %288, %cst_244 {dimension_numbers = #tpu.dot_dimension_numbers<[1], [0], [0], [1], [0, 0, 1, 1], [], []>} : vector<16x32xf32>, vector<32x8xf32>, vector<16x8xf32> -> vector<16x8xf32>
    %290 = arith.addf %285, %289 : vector<16x8xf32>
    %c4_245 = arith.constant 4 : index
    %c0_246 = arith.constant 0 : index
    %291 = vector.load %arg20[%c4_245, %c0_246] : memref<38x32xf32, #tpu.memory_space<vmem>>, vector<16x32xf32>
    %c2_247 = arith.constant 2 : index
    %c0_248 = arith.constant 0 : index
    %c0_249 = arith.constant 0 : index
    %292 = vector.load %arg14[%c2_247, %c0_248, %c0_249] : memref<3x32x8xf32, #tpu.memory_space<vmem>>, vector<1x32x8xf32>
    %293 = vector.shape_cast %292 : vector<1x32x8xf32> to vector<32x8xf32>
    %cst_250 = arith.constant dense<0.000000e+00> : vector<16x8xf32>
    %294 = tpu.matmul %291, %293, %cst_250 {dimension_numbers = #tpu.dot_dimension_numbers<[1], [0], [0], [1], [0, 0, 1, 1], [], []>} : vector<16x32xf32>, vector<32x8xf32>, vector<16x8xf32> -> vector<16x8xf32>
    %295 = arith.addf %290, %294 : vector<16x8xf32>
    %c0_251 = arith.constant 0 : index
    %c0_252 = arith.constant 0 : index
    %c0_253 = arith.constant 0 : index
    %296 = vector.load %arg18[%c0_251, %c0_252, %c0_253] : memref<1x16x8xf32, #tpu.memory_space<vmem>>, vector<1x16x8xf32>
    %297 = vector.shape_cast %296 : vector<1x16x8xf32> to vector<16x8xf32>
    %298 = vector.shape_cast %295 : vector<16x8xf32> to vector<1x16x8xf32>
    tpu.vector_store %arg18[%c0_251, %c0_252, %c0_253], %298 {strides = array<i32>} : memref<1x16x8xf32, #tpu.memory_space<vmem>>, vector<1x16x8xf32>,
    %c0_254 = arith.constant 0 : index
    %c0_255 = arith.constant 0 : index
    %299 = vector.load %arg16[%c0_254, %c0_255] : memref<8x32xf32, #tpu.memory_space<vmem>>, vector<8x32xf32>
    %cst_256 = arith.constant dense<0.000000e+00> : vector<16x32xf32>
    %300 = tpu.matmul %295, %299, %cst_256 {dimension_numbers = #tpu.dot_dimension_numbers<[1], [0], [0], [1], [0, 0, 1, 1], [], []>} : vector<16x8xf32>, vector<8x32xf32>, vector<16x32xf32> -> vector<16x32xf32>
    %301 = arith.mulf %295, %295 : vector<16x8xf32>
    %cst_257 = arith.constant dense<0.000000e+00> : vector<16xf32>
    %302 = vector.multi_reduction <add>, %301, %cst_257 [1] : vector<16x8xf32> to vector<16xf32>
    %303 = vector.shape_cast %302 : vector<16xf32> to vector<16x1xf32>
    %cst_258 = arith.constant 2.000000e+00 : f32
    %304 = vector.broadcast %cst_258 : f32 to vector<16x32xf32>
    %305 = arith.mulf %304, %300 : vector<16x32xf32>
    %306 = vector.broadcast %303 : vector<16x1xf32> to vector<16x32xf32>
    %307 = arith.subf %306, %305 : vector<16x32xf32>
    %c0_259 = arith.constant 0 : index
    %c0_260 = arith.constant 0 : index
    %308 = vector.load %arg17[%c0_259, %c0_260] : memref<1x32xf32, #tpu.memory_space<vmem>>, vector<1x32xf32>
    %309 = vector.broadcast %308 : vector<1x32xf32> to vector<16x32xf32>
    %310 = arith.addf %307, %309 : vector<16x32xf32>
    %cst_261 = arith.constant dense<0x7F800000> : vector<16xf32>
    %311 = vector.multi_reduction <minimumf>, %310, %cst_261 [1] : vector<16x32xf32> to vector<16xf32>
    %312 = vector.shape_cast %311 : vector<16xf32> to vector<16x1xf32>
    %313 = tpu.iota {dimensions = array<i32: 1>} : vector<16x32xi32>
    %314 = arith.sitofp %313 : vector<16x32xi32> to vector<16x32xf32>
    %315 = vector.broadcast %312 : vector<16x1xf32> to vector<16x32xf32>
    %316 = arith.cmpf ole, %310, %315 : vector<16x32xf32>
    %cst_262 = arith.constant 3.200000e+01 : f32
    %317 = vector.broadcast %cst_262 : f32 to vector<16x32xf32>
    %318 = arith.select %316, %314, %317 : vector<16x32xi1>, vector<16x32xf32>
    %cst_263 = arith.constant dense<0x7F800000> : vector<16xf32>
    %319 = vector.multi_reduction <minimumf>, %318, %cst_263 [1] : vector<16x32xf32> to vector<16xf32>
    %320 = vector.shape_cast %319 : vector<16xf32> to vector<16x1xf32>
    %321 = arith.fptosi %320 : vector<16x1xf32> to vector<16x1xi32>
    %c0_264 = arith.constant 0 : index
    %c0_265 = arith.constant 0 : index
    %c0_266 = arith.constant 0 : index
    %322 = vector.load %arg19[%c0_264, %c0_265, %c0_266] : memref<1x16x1xi32, #tpu.memory_space<vmem>>, vector<1x16x1xi32>
    %323 = vector.shape_cast %322 : vector<1x16x1xi32> to vector<16x1xi32>
    %324 = vector.shape_cast %321 : vector<16x1xi32> to vector<1x16x1xi32>
    tpu.vector_store %arg19[%c0_264, %c0_265, %c0_266], %324 {strides = array<i32>} : memref<1x16x1xi32, #tpu.memory_space<vmem>>, vector<1x16x1xi32>,
    return
  }
  func.func @transform_0(%arg0: i32) -> (i32, i32, i32) {
    %c0_i32 = arith.constant 0 : i32
    %c0_i32_0 = arith.constant 0 : i32
    %c0_i32_1 = arith.constant 0 : i32
    return %arg0, %c0_i32, %c0_i32_0 : i32, i32, i32
  }
  func.func @transform_1(%arg0: i32) -> (i32, i32, i32) {
    %c0_i32 = arith.constant 0 : i32
    %c0_i32_0 = arith.constant 0 : i32
    %c0_i32_1 = arith.constant 0 : i32
    %c0_i32_2 = arith.constant 0 : i32
    return %c0_i32, %c0_i32_0, %c0_i32_1 : i32, i32, i32
  }
  func.func @transform_2(%arg0: i32) -> (i32, i32) {
    %c0_i32 = arith.constant 0 : i32
    %c0_i32_0 = arith.constant 0 : i32
    %c0_i32_1 = arith.constant 0 : i32
    return %c0_i32, %c0_i32_0 : i32, i32
  }
  func.func @transform_3(%arg0: i32) -> (i32, i32, i32, i32) {
    %c0_i32 = arith.constant 0 : i32
    %c0_i32_0 = arith.constant 0 : i32
    %c0_i32_1 = arith.constant 0 : i32
    %c0_i32_2 = arith.constant 0 : i32
    %c0_i32_3 = arith.constant 0 : i32
    return %c0_i32, %c0_i32_0, %c0_i32_1, %c0_i32_2 : i32, i32, i32, i32
  }
  func.func @transform_4(%arg0: i32) -> (i32, i32, i32) {
    %c0_i32 = arith.constant 0 : i32
    %c0_i32_0 = arith.constant 0 : i32
    %c0_i32_1 = arith.constant 0 : i32
    %c0_i32_2 = arith.constant 0 : i32
    return %c0_i32, %c0_i32_0, %c0_i32_1 : i32, i32, i32
  }
  func.func @transform_5(%arg0: i32) -> (i32, i32, i32) {
    %c0_i32 = arith.constant 0 : i32
    %c0_i32_0 = arith.constant 0 : i32
    %c0_i32_1 = arith.constant 0 : i32
    %c0_i32_2 = arith.constant 0 : i32
    return %c0_i32, %c0_i32_0, %c0_i32_1 : i32, i32, i32
  }
  func.func @transform_6(%arg0: i32) -> (i32, i32, i32) {
    %c0_i32 = arith.constant 0 : i32
    %c0_i32_0 = arith.constant 0 : i32
    %c0_i32_1 = arith.constant 0 : i32
    %c0_i32_2 = arith.constant 0 : i32
    return %c0_i32, %c0_i32_0, %c0_i32_1 : i32, i32, i32
  }
  func.func @transform_7(%arg0: i32) -> (i32, i32, i32) {
    %c0_i32 = arith.constant 0 : i32
    %c0_i32_0 = arith.constant 0 : i32
    %c0_i32_1 = arith.constant 0 : i32
    %c0_i32_2 = arith.constant 0 : i32
    return %c0_i32, %c0_i32_0, %c0_i32_1 : i32, i32, i32
  }
  func.func @transform_8(%arg0: i32) -> (i32, i32) {
    %c0_i32 = arith.constant 0 : i32
    %c0_i32_0 = arith.constant 0 : i32
    %c0_i32_1 = arith.constant 0 : i32
    return %c0_i32, %c0_i32_0 : i32, i32
  }
  func.func @transform_9(%arg0: i32) -> (i32, i32, i32, i32) {
    %c0_i32 = arith.constant 0 : i32
    %c0_i32_0 = arith.constant 0 : i32
    %c0_i32_1 = arith.constant 0 : i32
    %c0_i32_2 = arith.constant 0 : i32
    %c0_i32_3 = arith.constant 0 : i32
    return %c0_i32, %c0_i32_0, %c0_i32_1, %c0_i32_2 : i32, i32, i32, i32
  }
  func.func @transform_10(%arg0: i32) -> (i32, i32, i32) {
    %c0_i32 = arith.constant 0 : i32
    %c0_i32_0 = arith.constant 0 : i32
    %c0_i32_1 = arith.constant 0 : i32
    %c0_i32_2 = arith.constant 0 : i32
    return %c0_i32, %c0_i32_0, %c0_i32_1 : i32, i32, i32
  }
  func.func @transform_11(%arg0: i32) -> (i32, i32, i32) {
    %c0_i32 = arith.constant 0 : i32
    %c0_i32_0 = arith.constant 0 : i32
    %c0_i32_1 = arith.constant 0 : i32
    %c0_i32_2 = arith.constant 0 : i32
    return %c0_i32, %c0_i32_0, %c0_i32_1 : i32, i32, i32
  }
  func.func @transform_12(%arg0: i32) -> (i32, i32, i32) {
    %c0_i32 = arith.constant 0 : i32
    %c0_i32_0 = arith.constant 0 : i32
    %c0_i32_1 = arith.constant 0 : i32
    %c0_i32_2 = arith.constant 0 : i32
    return %c0_i32, %c0_i32_0, %c0_i32_1 : i32, i32, i32
  }
  func.func @transform_13(%arg0: i32) -> (i32, i32, i32) {
    %c0_i32 = arith.constant 0 : i32
    %c0_i32_0 = arith.constant 0 : i32
    %c0_i32_1 = arith.constant 0 : i32
    %c0_i32_2 = arith.constant 0 : i32
    return %c0_i32, %c0_i32_0, %c0_i32_1 : i32, i32, i32
  }
  func.func @transform_14(%arg0: i32) -> (i32, i32) {
    %c0_i32 = arith.constant 0 : i32
    %c0_i32_0 = arith.constant 0 : i32
    %c0_i32_1 = arith.constant 0 : i32
    return %c0_i32, %c0_i32_0 : i32, i32
  }
  func.func @transform_15(%arg0: i32) -> (i32, i32) {
    %c0_i32 = arith.constant 0 : i32
    %c0_i32_0 = arith.constant 0 : i32
    %c0_i32_1 = arith.constant 0 : i32
    return %c0_i32, %c0_i32_0 : i32, i32
  }
  func.func @transform_16(%arg0: i32) -> (i32, i32) {
    %c0_i32 = arith.constant 0 : i32
    %c0_i32_0 = arith.constant 0 : i32
    %c0_i32_1 = arith.constant 0 : i32
    return %c0_i32, %c0_i32_0 : i32, i32
  }
  func.func @transform_17(%arg0: i32) -> (i32, i32, i32) {
    %c0_i32 = arith.constant 0 : i32
    %c0_i32_0 = arith.constant 0 : i32
    %c0_i32_1 = arith.constant 0 : i32
    return %arg0, %c0_i32, %c0_i32_0 : i32, i32, i32
  }
  func.func @transform_18(%arg0: i32) -> (i32, i32, i32) {
    %c0_i32 = arith.constant 0 : i32
    %c0_i32_0 = arith.constant 0 : i32
    %c0_i32_1 = arith.constant 0 : i32
    return %arg0, %c0_i32, %c0_i32_0 : i32, i32, i32
  }
}

</mosaic_0001>

<bundles_post_ra>
// kernel: _lambda_.1
= control target key start
LH: loop header
LB: loop body
LE: loop exit
PB: predicated region body
PF: predicated region fallthrough
CT: control target
= control target key end

     0   :  { %s7054_s0 = inlined_call_operand.vmem [shape: f32[2,66,4], index: 0, kind: input, shape index: {}]   ;;  %s7055_s1 = inlined_call_operand.hbm [shape: f32[4,4,32], index: 1, kind: input, shape index: {}]   ;;  %s7056_s2 = inlined_call_operand.hbm [shape: f32[1,32], index: 2, kind: input, shape index: {}]   ;;  %s7057_s3 = inlined_call_operand.vmem [shape: f32[2,3,32,32], index: 3, kind: input, shape index: {}]   ;;  %s7058_s4 = inlined_call_operand.hbm [shape: f32[2,1,32], index: 4, kind: input, shape index: {}]   ;;  %s7059_s5 = inlined_call_operand.hbm [shape: f32[2,32,32], index: 5, kind: input, shape index: {}]   ;;  %s7060_s6 = inlined_call_operand.hbm [shape: f32[2,1,32], index: 6, kind: input, shape index: {}]   ;;  %s7061_s7 = inlined_call_operand.vmem [shape: f32[4,32,32], index: 7, kind: input, shape index: {}]   ;;  %s7062_s8 = inlined_call_operand.hbm [shape: f32[1,32], index: 8, kind: input, shape index: {}]   ;;  %s7063_s9 = inlined_call_operand.vmem [shape: f32[2,3,32,32], index: 9, kind: input, shape index: {}]   ;;  %s7064_s10 = inlined_call_operand.hbm [shape: f32[2,1,32], index: 10, kind: input, shape index: {}]   ;;  %s7065_s11 = inlined_call_operand.hbm [shape: f32[2,32,32], index: 11, kind: input, shape index: {}]   ;;  %s7066_s12 = inlined_call_operand.hbm [shape: f32[2,1,32], index: 12, kind: input, shape index: {}]   ;;  %s7067_s13 = inlined_call_operand.vmem [shape: f32[3,32,8], index: 13, kind: input, shape index: {}]   ;;  %s7068_s14 = inlined_call_operand.hbm [shape: f32[1,8], index: 14, kind: input, shape index: {}]   ;;  %s7069_s15 = inlined_call_operand.vmem [shape: f32[8,32], index: 15, kind: input, shape index: {}]   ;;  %s7070_s16 = inlined_call_operand.hbm [shape: f32[1,32], index: 16, kind: input, shape index: {}]   ;;  %s7071_s17 = inlined_call_operand.vmem [shape: f32[2,16,8], index: 17, kind: output, shape index: {0}]   ;;  %s7072_s18 = inlined_call_operand.vmem [shape: s32[2,16,1], index: 18, kind: output, shape index: {1}]  }
   0x1   :  { %7076 = sst [smem:[#allocation27_spill]] %s7054_s0 }
   0x2   :  { %7077 = sst [smem:[#allocation28_spill]] %s7055_s1 }
   0x3   :  { %7078 = sst [smem:[#allocation29_spill]] %s7056_s2 }
   0x4   :  { %24 = vsyncpa [#allocation4], 0 }
   0x5   :  { %25 = vsyncpa [#allocation6], 0 }
   0x6   :  { %26 = vsyncpa [#allocation9], 0 }
   0x7   :  { %27 = vsyncpa [#allocation12], 0 }
   0x8   :  { %28 = vsyncpa [#allocation15], 0 }
   0x9   :  { %29 = vsyncpa [#allocation18], 0  ;;  %s6178_s27 = smov 0  }
   0xa LB: > { %7079 = sst [smem:[#allocation26_spill]] %s6063_s27  ;;  %s6065_s28 = smov [#allocation5]   ;;  %s6063_s27 = sphi %s6178_s27, %s35_s27  }
   0xb   : > { %s480_s29 = sshll.u32 %s6065_s28, 4  ;;  %s6184_s30 = sadd.s32 4294967295, %s6063_s27   ;;  %s481_s29 = int_to_ptr.vmem [resolvable:$true] %s480_s29 }
   0xc   : > { %p4659_p0 = scmp.ge.s32.totalorder %s6063_s27, 1  ;;  %p454_p1 = scmp.lt.s32.totalorder %s6063_s27, 3 }
   0xd   : > { %p7074_p2 = scmp.eq.s32.totalorder %s6184_s30, 0  ;;  %s6066_s19 = smov [#allocation8]  }
   0xe   : > { %p6189_p3 = pnand %p4659_p0, %p454_p1  ;;  %s506_s1 = sshll.u32 %s6066_s19, 4  ;;  %s6195_s1 = int_to_ptr.vmem [resolvable:$true] %s506_s1 }
   0xf   : > { %s6067_s21 = smov [#allocation11]   ;;  %s6068_s2 = smov [#allocation14]  }
  0x10   : > { %s7080_s0 = scalar_select %p6189_p3, 1, 0 }
  0x11   : > { %p5665_p4 = pneg %p6189_p3  ;;  %s536_s22 = sshll.u32 %s6067_s21, 4  ;;  %s6203_s22 = int_to_ptr.vmem [resolvable:$true] %s536_s22 }
  0x12   : > { %s6205_s23 = sshll.u32 %s6068_s2, 4  ;;  %s5758_s25 = scalar_lea.vmem %s481_s29, 16  ;;  %s563_s23 = int_to_ptr.vmem [resolvable:$true] %s6205_s23 }
  0x13   : > { %p6199_p5 = pnand %p7074_p2, %p5665_p4  ;;  %p5759_p7 = scmp.ne.s32.totalorder %s481_s29, %s5758_s25 }
  0x14   : > { %s5765_s26 = scalar_lea.vmem %s481_s29, 32  ;;  %p5766_p10 = scmp.lt.s32.totalorder %s481_s29, %s481_s29 }
  0x15   : > { %p6209_p6 = pneg %p6199_p5  ;;  %p5767_p11 = scmp.lt.s32.totalorder %s5765_s26, %s5758_s25 }
  0x17   : > { %p5761_p8 = pnand %p5759_p7, %p6209_p6  ;;  %p5768_p12 = por %p5767_p11, %p5766_p10 }
  0x19   : > { %p5762_p9 = pneg %p5761_p8 }
  0x1b   : > { %p5769_p13 = pnand %p5768_p12, %p5762_p9 }
  0x1d   : > { %5772 = shalt.err (!%p5769_p13)
}
  0x1e   : > { %s7083_s21 = sld [smem:[#allocation29_spill]]  ;;  %s5784_s2 = scalar_lea.vmem %s6195_s1, 1024 }
  0x1f   : > { %p5785_p0 = scmp.ne.s32.totalorder %s6195_s1, %s5784_s2  ;;  %p5792_p7 = scmp.lt.s32.totalorder %s6195_s1, %s6195_s1 }
  0x20   : > { %p5793_p8 = scmp.lt.s32.totalorder %s5784_s2, %s5784_s2 }
  0x21   : > { %p5787_p1 = pnand %p5785_p0, %p6209_p6 }
  0x22   : > { %p5794_p9 = por %p5793_p8, %p5792_p7 }
  0x23   : > { %p5788_p4 = pneg %p5787_p1 }
  0x24   : > { %5671 = dma.hbm_to_vmem [thread:$0]  (!%p6199_p5), %s7083_s21, 16, %s481_s29, [#allocation6]  }
  0x25   : > { %p5795_p10 = pnand %p5794_p9, %p5788_p4 }
  0x27   : > { %5798 = shalt.err (!%p5795_p10)
}
  0x28   : > { %s6069_s25 = smov 128   ;;  %s6070_s29 = smov 8  }
  0x29   : > { %5677 = dma.hbm_to_vmem [thread:$0]  (!%p6199_p5), %s7059_s5, 1024, %s6195_s1, [#allocation9], %s6069_s25, %s6069_s25, %s6070_s29  }
  0x2a   : > { %s5810_s19 = scalar_lea.vmem %s6203_s22, 16  ;;  %s5817_s21 = scalar_lea.vmem %s6203_s22, 32 }
  0x2b   : > { %p5811_p11 = scmp.ne.s32.totalorder %s6203_s22, %s5810_s19  ;;  %p5818_p0 = scmp.lt.s32.totalorder %s6203_s22, %s6203_s22 }
  0x2c   : > { %p5819_p1 = scmp.lt.s32.totalorder %s5817_s21, %s5810_s19 }
  0x2d   : > { %p5813_p12 = pnand %p5811_p11, %p6209_p6 }
  0x2e   : > { %p5820_p4 = por %p5819_p1, %p5818_p0 }
  0x2f   : > { %p5814_p13 = pneg %p5813_p12 }
  0x31   : > { %p5821_p7 = pnand %p5820_p4, %p5814_p13 }
  0x33   : > { %5824 = shalt.err (!%p5821_p7)
}
  0x34   : > { %5683 = dma.hbm_to_vmem [thread:$0]  (!%p6199_p5), %s7062_s8, 16, %s6203_s22, [#allocation12]  }
  0x35   : > { %s5836_s1 = scalar_lea.vmem %s563_s23, 1024  ;;  %p5844_p11 = scmp.lt.s32.totalorder %s563_s23, %s563_s23 }
  0x36   : > { %p5837_p8 = scmp.ne.s32.totalorder %s563_s23, %s5836_s1  ;;  %p5845_p12 = scmp.lt.s32.totalorder %s5836_s1, %s5836_s1 }
  0x38   : > { %p5839_p9 = pnand %p5837_p8, %p6209_p6  ;;  %p5846_p0 = por %p5845_p12, %p5844_p11 }
  0x3a   : > { %p5840_p10 = pneg %p5839_p9 }
  0x3c   : > { %p5847_p13 = pnand %p5846_p0, %p5840_p10 }
  0x3e   : > { %5850 = shalt.err (!%p5847_p13)
}
  0x3f   : > { %5689 = dma.hbm_to_vmem [thread:$0]  (!%p6199_p5), %s7065_s11, 1024, %s563_s23, [#allocation15], %s6069_s25, %s6069_s25, %s6070_s29  }
  0x40   : > { %s6071_s27 = smov [#allocation17]   ;;  %s6072_s19 = smov [#allocation3]  }
  0x41   : > { %s592_s22 = sshll.u32 %s6071_s27, 4  ;;  %s466_s21 = sshll.u32 %s6072_s19, 4  ;;  %s593_s22 = int_to_ptr.vmem [resolvable:$true] %s592_s22  ;;  %s467_s21 = int_to_ptr.vmem [resolvable:$true] %s466_s21 }
  0x42   : > { %s5862_s2 = scalar_lea.vmem %s593_s22, 16  ;;  %s5869_s1 = scalar_lea.vmem %s593_s22, 32 }
  0x43   : > { %p5863_p1 = scmp.ne.s32.totalorder %s593_s22, %s5862_s2  ;;  %p5870_p8 = scmp.lt.s32.totalorder %s593_s22, %s593_s22 }
  0x44   : > { %p5871_p9 = scmp.lt.s32.totalorder %s5869_s1, %s5862_s2 }
  0x45   : > { %p5865_p4 = pnand %p5863_p1, %p6209_p6 }
  0x46   : > { %p5872_p10 = por %p5871_p9, %p5870_p8 }
  0x47   : > { %p5866_p7 = pneg %p5865_p4 }
  0x49   : > { %p5873_p11 = pnand %p5872_p10, %p5866_p7 }
  0x4b   : > { %5876 = shalt.err (!%p5873_p11)
}
  0x4c   : > { %5695 = dma.hbm_to_vmem [thread:$0]  (!%p6199_p5), %s7068_s14, 16, %s593_s22, [#allocation18]  }
  0x4d   : > { %s5888_s25 = scalar_lea.vmem %s467_s21, 256  ;;  %p5896_p1 = scmp.lt.s32.totalorder %s467_s21, %s467_s21 }
  0x4e   : > { %p5889_p12 = scmp.ne.s32.totalorder %s467_s21, %s5888_s25  ;;  %p5897_p4 = scmp.lt.s32.totalorder %s5888_s25, %s5888_s25 }
  0x50   : > { %p5891_p0 = pnand %p5889_p12, %p6209_p6  ;;  %p5898_p2 = por %p5897_p4, %p5896_p1 }
  0x52   : > { %p5892_p13 = pneg %p5891_p0 }
  0x54   : > { %p5899_p3 = pnand %p5898_p2, %p5892_p13 }
  0x56   : > { %5902 = shalt.err (!%p5899_p3)
}
  0x57   : > { %s6073_s29 = smov 64   ;;  %s6074_s28 = smov 4  }
  0x58   : > { %s7084_s2 = sld [smem:[#allocation28_spill]]  ;;  %s6075_s22 = smov [#allocation7]  }
  0x59   : > { %s493_s1 = sshll.u32 %s6075_s22, 4  ;;  %s494_s1 = int_to_ptr.vmem [resolvable:$true] %s493_s1 }
  0x5a   : > { %s5914_s26 = scalar_lea.vmem %s494_s1, 32  ;;  %p5922_p10 = scmp.lt.s32.totalorder %s494_s1, %s494_s1 }
  0x5b   : > { %p5915_p7 = scmp.ne.s32.totalorder %s494_s1, %s5914_s26  ;;  %p5923_p2 = scmp.lt.s32.totalorder %s5914_s26, %s5914_s26 }
  0x5d   : > { %p5917_p8 = pnand %p5915_p7, %p6209_p6  ;;  %p5924_p3 = por %p5923_p2, %p5922_p10 }
  0x5e   : > { %5668 = dma.hbm_to_vmem [thread:$0]  (!%p6199_p5), %s7084_s2, 256, %s467_s21, [#allocation4], %s6073_s29, %s6073_s29, %s6074_s28  }
  0x5f   : > { %p5918_p9 = pneg %p5917_p8 }
  0x61   : > { %p5925_p11 = pnand %p5924_p3, %p5918_p9 }
  0x63   : > { %5928 = shalt.err (!%p5925_p11)
}
  0x64   : > { %s6076_s23 = smov 16   ;;  %s6077_s25 = smov 1  }
  0x65   : > { %5674 = dma.hbm_to_vmem [thread:$0]  (!%p6199_p5), %s7058_s4, 32, %s494_s1, [#allocation6], %s6076_s23, %s6076_s23, %s6077_s25  }
  0x66   : > { %s6078_s28 = smov [#allocation10]   ;;  %s6079_s19 = smov [#allocation13]  }
  0x67   : > { %s519_s27 = sshll.u32 %s6078_s28, 4  ;;  %s549_s2 = sshll.u32 %s6079_s19, 4  ;;  %s520_s27 = int_to_ptr.vmem [resolvable:$true] %s519_s27  ;;  %s550_s2 = int_to_ptr.vmem [resolvable:$true] %s549_s2 }
  0x68   : > { %s5940_s22 = scalar_lea.vmem %s520_s27, 32  ;;  %p5948_p1 = scmp.lt.s32.totalorder %s520_s27, %s520_s27 }
  0x69   : > { %p5941_p12 = scmp.ne.s32.totalorder %s520_s27, %s5940_s22  ;;  %p5949_p4 = scmp.lt.s32.totalorder %s5940_s22, %s5940_s22 }
  0x6b   : > { %p5943_p0 = pnand %p5941_p12, %p6209_p6  ;;  %p5950_p7 = por %p5949_p4, %p5948_p1 }
  0x6d   : > { %p5944_p13 = pneg %p5943_p0 }
  0x6f   : > { %p5951_p8 = pnand %p5950_p7, %p5944_p13 }
  0x71   : > { %5954 = shalt.err (!%p5951_p8)
}
  0x72   : > { %5680 = dma.hbm_to_vmem [thread:$0]  (!%p6199_p5), %s7060_s6, 32, %s520_s27, [#allocation9], %s6076_s23, %s6076_s23, %s6077_s25  }
  0x73   : > { %s5966_s21 = scalar_lea.vmem %s550_s2, 32  ;;  %p5974_p3 = scmp.lt.s32.totalorder %s550_s2, %s550_s2 }
  0x74   : > { %p5967_p9 = scmp.ne.s32.totalorder %s550_s2, %s5966_s21  ;;  %p5975_p11 = scmp.lt.s32.totalorder %s5966_s21, %s5966_s21 }
  0x76   : > { %p5969_p10 = pnand %p5967_p9, %p6209_p6  ;;  %p5976_p12 = por %p5975_p11, %p5974_p3 }
  0x78   : > { %p5970_p2 = pneg %p5969_p10 }
  0x7a   : > { %p5977_p0 = pnand %p5976_p12, %p5970_p2 }
  0x7c   : > { %5980 = shalt.err (!%p5977_p0)
}
  0x7d   : > { %5686 = dma.hbm_to_vmem [thread:$0]  (!%p6199_p5), %s7064_s10, 32, %s550_s2, [#allocation12], %s6076_s23, %s6076_s23, %s6077_s25  }
  0x7e   : > { %s6080_s27 = smov [#allocation16]   ;;  %s6081_s22 = smov [#allocation19]  }
  0x7f   : > { %s575_s19 = sshll.u32 %s6080_s27, 4  ;;  %s606_s1 = sshll.u32 %s6081_s22, 4  ;;  %s576_s19 = int_to_ptr.vmem [resolvable:$true] %s575_s19  ;;  %s607_s1 = int_to_ptr.vmem [resolvable:$true] %s606_s1 }
  0x80   : > { %s5992_s26 = scalar_lea.vmem %s576_s19, 32  ;;  %p6000_p7 = scmp.lt.s32.totalorder %s576_s19, %s576_s19 }
  0x81   : > { %p5993_p13 = scmp.ne.s32.totalorder %s576_s19, %s5992_s26  ;;  %p6001_p8 = scmp.lt.s32.totalorder %s5992_s26, %s5992_s26 }
  0x83   : > { %p5995_p1 = pnand %p5993_p13, %p6209_p6  ;;  %p6002_p9 = por %p6001_p8, %p6000_p7 }
  0x85   : > { %p5996_p4 = pneg %p5995_p1 }
  0x87   : > { %p6003_p10 = pnand %p6002_p9, %p5996_p4 }
  0x89   : > { %6006 = shalt.err (!%p6003_p10)
}
  0x8a   : > { %5692 = dma.hbm_to_vmem [thread:$0]  (!%p6199_p5), %s7066_s12, 32, %s576_s19, [#allocation15], %s6076_s23, %s6076_s23, %s6077_s25  }
  0x8b   : > { %s6018_s29 = scalar_lea.vmem %s607_s1, 16  ;;  %s6025_s28 = scalar_lea.vmem %s607_s1, 32 }
  0x8c   : > { %p6019_p2 = scmp.ne.s32.totalorder %s607_s1, %s6018_s29  ;;  %p6026_p12 = scmp.lt.s32.totalorder %s607_s1, %s607_s1 }
  0x8d   : > { %p6027_p0 = scmp.lt.s32.totalorder %s6025_s28, %s6018_s29 }
  0x8e   : > { %p6021_p3 = pnand %p6019_p2, %p6209_p6 }
  0x8f   : > { %p6028_p13 = por %p6027_p0, %p6026_p12 }
  0x90   : > { %p6022_p11 = pneg %p6021_p3 }
  0x92   : > { %p6029_p1 = pnand %p6028_p13, %p6022_p11 }
  0x94   : > { %6032 = shalt.err (!%p6029_p1)
}
  0x95   : > { %5698 = dma.hbm_to_vmem [thread:$0]  (!%p6199_p5), %s7070_s16, 16, %s607_s1, [#allocation18]  }
  0x96   : > { %p7085_p4 = scmp.ne.s32.totalorder %s7080_s0, 0 }
  0x97   : > { %p7086_p7 = scmp.eq.s32.totalorder (!%p7085_p4), %s6184_s30, 0 }
  0x98   : > { %627 = sbr.rel (%p7085_p4) target bundleno = 4057 (0xfd9), region = 88 }
  0x9d   : > { %6038 = dma.done.wait (%p7086_p7), [#allocation4], 256   ;;  %p7087_p6 = pmov %p7086_p7 }
  0x9f   : > { %6040 = vsyncadd (%p7087_p6), [#allocation4], 4294967040  ;;  %p7088_p8 = pmov %p7087_p6 }
  0xa0   : > { %p7089_p9 = pmov %p7087_p6 }
  0xa1   : > { %6042 = dma.done.wait (%p7088_p8), [#allocation6], 48  }
  0xa2   : > { %6044 = vsyncadd (%p7089_p9), [#allocation6], 4294967248  ;;  %p7090_p10 = pmov %p7087_p6 }
  0xa3   : > { %p7091_p5 = pmov %p7087_p6 }
  0xa4   : > { %6046 = dma.done.wait (%p7090_p10), [#allocation9], 1056  }
  0xa5   : > { %6048 = vsyncadd (%p7091_p5), [#allocation9], 4294966240  ;;  %p7092_p2 = pmov %p7091_p5 }
  0xa7   : > { %6050 = dma.done.wait (%p7092_p2), [#allocation12], 48   ;;  %p7093_p3 = pmov %p7092_p2 }
  0xa8   : > { %p7094_p11 = pmov %p7092_p2 }
  0xa9   : > { %6052 = vsyncadd (%p7093_p3), [#allocation12], 4294967248 }
  0xaa   : > { %6054 = dma.done.wait (%p7094_p11), [#allocation15], 1056   ;;  %p7095_p12 = pmov %p7092_p2 }
  0xab   : > { %p7096_p0 = pmov %p7092_p2 }
  0xac   : > { %6056 = vsyncadd (%p7095_p12), [#allocation15], 4294966240 }
  0xad   : > { %6058 = dma.done.wait (%p7096_p0), [#allocation18], 32   ;;  %p7097_p13 = pmov %p7096_p0 }
  0xae   : > { %p726_p1 = scmp.lt.s32.totalorder %s6184_s30, 1  ;;  %v750_v0 = vlaneseq  ;;  %vm794_vm0 = vcmask 1041408   ;;  %vm781_vm1 = vcmask 539648   ;;  %s7098_s23 = sld [smem:[#allocation27_spill]]  ;;  %v6082_v6 = vmov 0.0  }
  0xaf   : > { %6060 = vsyncadd (%p7097_p13), [#allocation18], 4294967264  ;;  %v883_v24 = vld [vmem:[#allocation3] sm:$0xf]  ;;  %vm897_vm6 = vcmask 1043456   ;;  %vm884_vm7 = vcmask 31744  }
  0xb0   : > { %s7101_s30 = smov (!%p726_p1, %s6184_s30), 1  ;;  %v751_v1 = vshrl.u32 %v750_v0, 7  ;;  %v6344_v2 = vand.u32 127, %v750_v0  ;;  %5178 = vmatprep.subr.msk.mxu1 %vm897_vm6, %v883_v24  ;;  %v1104_v45 = vld [vmem:[#allocation3 + $0x4] sm:$0xf] }
  0xb1   : > { %s5616_s0 = smul.u32 72, %s7101_s30  ;;  %5179 = vmatpush3.msk.msra.mxu1 %vm897_vm6, %v883_v24  ;;  %v1323_v46 = vld [vmem:[#allocation3 + $0x8] sm:$0xf]  ;;  %s4895_s19 = sshll.u32 %s7101_s30, 4 }
  0xb2   : > { %v6347_v3 = vmul.u32 2, %v751_v1  ;;  %v752_v10 = vadd.s32 8, %v751_v1  ;;  %v753_v12 = vadd.s32 16, %v751_v1  ;;  %v754_v15 = vadd.s32 24, %v751_v1  ;;  %s735_s2 = scalar_lea.vmem %s7071_s17, %s4895_s19  ;;  %s740_s28 = scalar_lea.vmem %s7072_s18, %s4895_s19 }
  0xb4   : > { %s6352_s25 = scalar_lea.vmem %s7098_s23, %s5616_s0  ;;  %vm769_vm2 = vcmp.eq.s32.totalorder %v6344_v2, %v6347_v3  ;;  %v6390_v14 = vmul.u32 2, %v752_v10  ;;  %v6396_v17 = vmul.u32 2, %v753_v12  ;;  %v990_v25 = vadd.s32 1, %v6347_v3 }
  0xb5   : > { %v6357_v4 = vld [vmem:[%s6352_s25 + $0x40] sm:$0x3]  ;;  %v6360_v5 = vld [vmem:[%s6352_s25 + $0x38] sm:$0xff]  ;;  %v6363_v7 = vsel %vm769_vm2, 1.0, %v6082_v6  ;;  %v6372_v8 = vld [vmem:[%s6352_s25 + $0x30] sm:$0xff]  ;;  %v6406_v19 = vmul.u32 2, %v754_v15 }
  0xb6   : > { %5154 = vmatprep.subr.msk.mxu0 %vm794_vm0, %v6357_v4  ;;  %5172 = vmatprep.mubr.msk.f32.mxu0 %vm781_vm1, %v6363_v7  ;;  %v6377_v9 = vld [vmem:[%s6352_s25 + $0x28] sm:$0xff]  ;;  %v6382_v11 = vld [vmem:[%s6352_s25 + $0x20] sm:$0xff]  ;;  %v6387_v13 = vld [vmem:[%s6352_s25 + $0x18] sm:$0xff]  ;;  %vm770_vm3 = vcmp.eq.s32.totalorder %v6344_v2, %v6390_v14  ;;  %vm771_vm4 = vcmp.eq.s32.totalorder %v6344_v2, %v6396_v17  ;;  %vm994_vm8 = vcmp.eq.s32.totalorder %v6344_v2, %v990_v25  ;;  %v991_v31 = vadd.s32 1, %v6390_v14 }
  0xb7   : > { %5155 = vmatpush3.msk.msra.mxu0 %vm794_vm0, %v6357_v4  ;;  %v6394_v16 = vld [vmem:[%s6352_s25 + $0x10] sm:$0xff]  ;;  %v6401_v18 = vld [vmem:[%s6352_s25 + $0x8] sm:$0xff]  ;;  %v6410_v20 = vld [vmem:[%s6352_s25] sm:$0xff]  ;;  %v6417_v21 = vsel %vm770_vm3, 1.0, %v6082_v6  ;;  %v4692_v22 = vsel %vm771_vm4, 1.0, %v6082_v6  ;;  %vm772_vm5 = vcmp.eq.s32.totalorder %v6344_v2, %v6406_v19  ;;  %5186 = vmatprep.subr.msk.mxu1 %vm794_vm0, %v6357_v4  ;;  %v6441_v30 = vsel %vm994_vm8, 1.0, %v6082_v6 }
  0xb8   : > { %5156 = vmatprep.subr.mxu0 %v6360_v5  ;;  %v4693_v23 = vsel %vm772_vm5, 1.0, %v6082_v6  ;;  %v992_v32 = vadd.s32 1, %v6396_v17  ;;  %vm995_vm9 = vcmp.eq.s32.totalorder %v6344_v2, %v991_v31  ;;  %v993_v33 = vadd.s32 1, %v6406_v19 }
  0xb9   : > { %5157 = vmatpush3.msra.mxu0 %v6360_v5  ;;  %v1209_v34 = vadd.s32 2, %v6347_v3  ;;  %v6467_v35 = vsel %vm995_vm9, 1.0, %v6082_v6  ;;  %v1210_v39 = vadd.s32 2, %v6390_v14  ;;  %v1211_v40 = vadd.s32 2, %v6396_v17 }
  0xba   : > { %5158 = vmatprep.subr.mxu0 %v6372_v8  ;;  %vm996_vm10 = vcmp.eq.s32.totalorder %v6344_v2, %v992_v32  ;;  %vm997_vm11 = vcmp.eq.s32.totalorder %v6344_v2, %v993_v33  ;;  %v1212_v41 = vadd.s32 2, %v6406_v19  ;;  %v1428_v55 = vadd.s32 3, %v6347_v3 }
  0xbb   : > { %5159 = vmatpush3.msra.mxu0 %v6372_v8  ;;  %v4706_v36 = vsel %vm996_vm10, 1.0, %v6082_v6  ;;  %vm1213_vm12 = vcmp.eq.s32.totalorder %v6344_v2, %v1209_v34  ;;  %v4707_v37 = vsel %vm997_vm11, 1.0, %v6082_v6  ;;  %vm1214_vm13 = vcmp.eq.s32.totalorder %v6344_v2, %v1210_v39  ;;  %v1681_v34 = vld [vmem:[%s7057_s3 + $0x18] sm:$0xff]  ;;  %v4753_v39 = vld [vmem:[%s7057_s3 + $0x30] sm:$0xff] }
  0xbc   : > { %5160 = vmatprep.subr.mxu0 %v6377_v9  ;;  %v6484_v38 = vsel %vm1213_vm12, 1.0, %v6082_v6  ;;  %vm1215_vm14 = vcmp.eq.s32.totalorder %v6344_v2, %v1211_v40  ;;  %v6508_v42 = vsel %vm1214_vm13, 1.0, %v6082_v6  ;;  %vm1216_vm15 = vcmp.eq.s32.totalorder %v6344_v2, %v1212_v41  ;;  %v1679_v40 = vld [vmem:[%s7057_s3 + $0x8] sm:$0xff] }
  0xbd   : > { %5161 = vmatpush3.msra.mxu0 %v6377_v9  ;;  %v4720_v43 = vsel %vm1215_vm14, 1.0, %v6082_v6  ;;  %v4721_v44 = vsel %vm1216_vm15, 1.0, %v6082_v6  ;;  %vm1432_vm2 = vcmp.eq.s32.totalorder %v6344_v2, %v1428_v55  ;;  %v1429_v61 = vadd.s32 3, %v6390_v14  ;;  %v4752_v41 = vld [vmem:[%s7057_s3 + $0x28] sm:$0xff] }
  0xbe   : > { %5162 = vmatprep.subr.mxu0 %v6382_v11  ;;  %v6539_v60 = vsel %vm1432_vm2, 1.0, %v6082_v6  ;;  %v1430_v62 = vadd.s32 3, %v6396_v17  ;;  %v1431_v63 = vadd.s32 3, %v6406_v19  ;;  %vm4459_vm10 = vcmask 7168  }
  0xbf   : > { %5163 = vmatpush3.msra.mxu0 %v6382_v11  ;;  %vm1433_vm3 = vcmp.eq.s32.totalorder %v6344_v2, %v1429_v61 }
  0xc0   : > { %5164 = vmatprep.subr.mxu0 %v6387_v13  ;;  %vm1434_vm4 = vcmp.eq.s32.totalorder %v6344_v2, %v1430_v62  ;;  %v6564_v0 = vsel %vm1433_vm3, 1.0, %v6082_v6  ;;  %vm1435_vm5 = vcmp.eq.s32.totalorder %v6344_v2, %v1431_v63  ;;  %v4761_v63 = vld [vmem:[%s7057_s3 + $0x50] sm:$0xff] }
  0xc1   : > { %5165 = vmatpush3.msra.mxu0 %v6387_v13  ;;  %v4734_v1 = vsel %vm1434_vm4, 1.0, %v6082_v6  ;;  %v4735_v3 = vsel %vm1435_vm5, 1.0, %v6082_v6 }
  0xc2   : > { %5166 = vmatprep.subr.mxu0 %v6394_v16 }
  0xc3   : > { %5167 = vmatpush3.msra.mxu0 %v6394_v16 }
  0xc4   : > { %5168 = vmatprep.subr.mxu0 %v6401_v18 }
  0xc5   : > { %5169 = vmatpush3.msra.mxu0 %v6401_v18 }
  0xc6   : > { %5170 = vmatprep.subr.mxu0 %v6410_v20 }
  0xc7   : > { %5171 = vmatpush3.msra.mxu0 %v6410_v20 }
  0xc8   : > { %5173 = vmatmul.mubr.msk.f32.vlgmr.msra.gmra.mxu0 %vm781_vm1, %v6417_v21  ;;  %5210 = vmatprep.subr.msk.mxu0 %vm897_vm6, %v1104_v45 }
  0xc9   : > { %5175 = vmatprep.mubr.msk.f32.mxu0 %vm781_vm1, %v4692_v22  ;;  %5211 = vmatpush3.msk.msra.mxu0 %vm897_vm6, %v1104_v45  ;;  %v4762_v45 = vld [vmem:[%s7057_s3 + $0x58] sm:$0xff] }
  0xca   : > { %5242 = vmatprep.subr.msk.mxu0 %vm897_vm6, %v1323_v46 }
  0xcc   : > { %5176 = vmatmul.mubr.msk.f32.gmra.mxu0 %vm781_vm1, %v4693_v23 }
 0x188   : > { %v5174_v26 = vpop.f32.mrf.mxu0 }
 0x18a   : > { %v864_v27 = vpop.f32.mrf.mxu0 }
 0x18b   : > { %5180 = vmatprep.mubr.msk.f32.mxu1 %vm884_vm7, %v864_v27 }
 0x18c   : > { %5181 = vmatmul.mubr.msk.f32.vlgmr.msra.gmra.mxu1 %vm884_vm7, %v5174_v26  ;;  %v5177_v28 = vpop.f32.mrf.mxu0 }
 0x18d   : > { %5187 = vmatpush3.msk.msra.mxu1 %vm794_vm0, %v6357_v4 }
 0x18e   : > { %5188 = vmatprep.subr.mxu1 %v6360_v5  ;;  %v874_v29 = vpop.f32.mrf.mxu0 }
 0x18f   : > { %5189 = vmatpush3.msra.mxu1 %v6360_v5  ;;  %5183 = vmatprep.mubr.msk.f32.mxu1 %vm884_vm7, %v874_v29 }
 0x190   : > { %5190 = vmatprep.subr.mxu1 %v6372_v8  ;;  %5184 = vmatmul.mubr.msk.f32.gmra.mxu1 %vm884_vm7, %v5177_v28 }
 0x191   : > { %5191 = vmatpush3.msra.mxu1 %v6372_v8  ;;  %5204 = vmatprep.mubr.msk.f32.mxu1 %vm781_vm1, %v6441_v30 }
 0x192   : > { %5192 = vmatprep.subr.mxu1 %v6377_v9 }
 0x193   : > { %5193 = vmatpush3.msra.mxu1 %v6377_v9 }
 0x194   : > { %5194 = vmatprep.subr.mxu1 %v6382_v11 }
 0x195   : > { %5195 = vmatpush3.msra.mxu1 %v6382_v11 }
 0x196   : > { %5196 = vmatprep.subr.mxu1 %v6387_v13 }
 0x197   : > { %5197 = vmatpush3.msra.mxu1 %v6387_v13 }
 0x198   : > { %5198 = vmatprep.subr.mxu1 %v6394_v16 }
 0x199   : > { %5199 = vmatpush3.msra.mxu1 %v6394_v16 }
 0x19a   : > { %5200 = vmatprep.subr.mxu1 %v6401_v18 }
 0x19b   : > { %5201 = vmatpush3.msra.mxu1 %v6401_v18 }
 0x19c   : > { %5202 = vmatprep.subr.mxu1 %v6410_v20 }
 0x19d   : > { %5203 = vmatpush3.msra.mxu1 %v6410_v20 }
 0x19e   : > { %5205 = vmatmul.mubr.msk.f32.vlgmr.msra.gmra.mxu1 %vm781_vm1, %v6467_v35  ;;  %5218 = vmatprep.subr.msk.mxu1 %vm794_vm0, %v6357_v4 }
 0x19f   : > { %5219 = vmatpush3.msk.msra.mxu1 %vm794_vm0, %v6357_v4  ;;  %5207 = vmatprep.mubr.msk.f32.mxu1 %vm781_vm1, %v4706_v36  ;;  %v4754_v36 = vld [vmem:[%s7057_s3 + $0x38] sm:$0xff] }
 0x1a0   : > { %5220 = vmatprep.subr.mxu1 %v6360_v5 }
 0x1a1   : > { %5221 = vmatpush3.msra.mxu1 %v6360_v5 }
 0x1a2   : > { %5208 = vmatmul.mubr.msk.f32.gmra.mxu1 %vm781_vm1, %v4707_v37  ;;  %5222 = vmatprep.subr.mxu1 %v6372_v8  ;;  %v1680_v37 = vld [vmem:[%s7057_s3 + $0x10] sm:$0xff] }
 0x1a3   : > { %5223 = vmatpush3.msra.mxu1 %v6372_v8  ;;  %5236 = vmatprep.mubr.msk.f32.mxu1 %vm781_vm1, %v6484_v38 }
 0x1a4   : > { %5224 = vmatprep.subr.mxu1 %v6377_v9 }
 0x1a5   : > { %5225 = vmatpush3.msra.mxu1 %v6377_v9 }
 0x1a6   : > { %5226 = vmatprep.subr.mxu1 %v6382_v11 }
 0x1a7   : > { %5227 = vmatpush3.msra.mxu1 %v6382_v11 }
 0x1a8   : > { %5228 = vmatprep.subr.mxu1 %v6387_v13 }
 0x1a9   : > { %5229 = vmatpush3.msra.mxu1 %v6387_v13 }
 0x1aa   : > { %5230 = vmatprep.subr.mxu1 %v6394_v16 }
 0x1ab   : > { %5231 = vmatpush3.msra.mxu1 %v6394_v16 }
 0x1ac   : > { %5232 = vmatprep.subr.mxu1 %v6401_v18 }
 0x1ad   : > { %5233 = vmatpush3.msra.mxu1 %v6401_v18 }
 0x1ae   : > { %5234 = vmatprep.subr.mxu1 %v6410_v20 }
 0x1af   : > { %5235 = vmatpush3.msra.mxu1 %v6410_v20 }
 0x1b0   : > { %5237 = vmatmul.mubr.msk.f32.vlgmr.msra.gmra.mxu1 %vm781_vm1, %v6508_v42 }
 0x1b1   : > { %5239 = vmatprep.mubr.msk.f32.mxu1 %vm781_vm1, %v4720_v43  ;;  %v1678_v43 = vld [vmem:[%s7057_s3] sm:$0xff] }
 0x1b4   : > { %5240 = vmatmul.mubr.msk.f32.gmra.mxu1 %vm781_vm1, %v4721_v44  ;;  %v4751_v44 = vld [vmem:[%s7057_s3 + $0x20] sm:$0xff] }
 0x24c   : > { %v5182_v47 = vpop.f32.mrf.mxu1 }
 0x24e   : > { %v967_v48 = vpop.f32.mrf.mxu1 }
 0x250   : > { %v5185_v49 = vpop.f32.mrf.mxu1 }
 0x252   : > { %v6522_v50 = vpop.f32.mrf.mxu1 }
 0x25e   : > { %v5206_v51 = vpop.f32.mrf.mxu1 }
 0x260   : > { %v1084_v52 = vpop.f32.mrf.mxu1 }
 0x261   : > { %5212 = vmatprep.mubr.msk.f32.mxu0 %vm884_vm7, %v1084_v52 }
 0x262   : > { %v5209_v53 = vpop.f32.mrf.mxu1  ;;  %5213 = vmatmul.mubr.msk.f32.vlgmr.msra.gmra.mxu0 %vm884_vm7, %v5206_v51 }
 0x263   : > { %5243 = vmatpush3.msk.msra.mxu0 %vm897_vm6, %v1323_v46 }
 0x264   : > { %v1094_v54 = vpop.f32.mrf.mxu1  ;;  %5250 = vmatprep.subr.msk.mxu0 %vm794_vm0, %v6357_v4 }
 0x265   : > { %5215 = vmatprep.mubr.msk.f32.mxu0 %vm884_vm7, %v1094_v54 }
 0x266   : > { %5216 = vmatmul.mubr.msk.f32.gmra.mxu0 %vm884_vm7, %v5209_v53 }
 0x270   : > { %v5238_v56 = vpop.f32.mrf.mxu1 }
 0x272   : > { %v1303_v57 = vpop.f32.mrf.mxu1 }
 0x273   : > { %5244 = vmatprep.mubr.msk.f32.mxu0 %vm884_vm7, %v1303_v57 }
 0x274   : > { %v5241_v58 = vpop.f32.mrf.mxu1  ;;  %5245 = vmatmul.mubr.msk.f32.vlgmr.msra.gmra.mxu0 %vm884_vm7, %v5238_v56 }
 0x275   : > { %5251 = vmatpush3.msk.msra.mxu0 %vm794_vm0, %v6357_v4  ;;  %v1542_v4 = vld [vmem:[#allocation3 + $0xc] sm:$0xf] }
 0x276   : > { %5252 = vmatprep.subr.mxu0 %v6360_v5  ;;  %v1313_v59 = vpop.f32.mrf.mxu1  ;;  %5274 = vmatprep.subr.msk.mxu1 %vm897_vm6, %v1542_v4 }
 0x277   : > { %5253 = vmatpush3.msra.mxu0 %v6360_v5  ;;  %5247 = vmatprep.mubr.msk.f32.mxu0 %vm884_vm7, %v1313_v59  ;;  %v4689_v5 = vld [vmem:[#allocation5] ss:$0 sm:$0xff] }
 0x278   : > { %5254 = vmatprep.subr.mxu0 %v6372_v8  ;;  %5248 = vmatmul.mubr.msk.f32.gmra.mxu0 %vm884_vm7, %v5241_v58  ;;  %v986_v10 = vadd.f32 %v4689_v5, %v967_v48 }
 0x279   : > { %5255 = vmatpush3.msra.mxu0 %v6372_v8  ;;  %5268 = vmatprep.mubr.msk.f32.mxu0 %vm781_vm1, %v6539_v60  ;;  %v987_v8 = vadd.f32 %v5182_v47, %v4689_v5 }
 0x27a   : > { %5256 = vmatprep.subr.mxu0 %v6377_v9  ;;  %5275 = vmatpush3.msk.msra.mxu1 %vm897_vm6, %v1542_v4  ;;  %vm1652_vm6 = vcmask 259072  }
 0x27b   : > { %5257 = vmatpush3.msra.mxu0 %v6377_v9  ;;  %1653 = vst.msk [vmem:[#allocation2 + $0x20] sm:$0x3f] %vm1652_vm6, %v6082_v6  ;;  %5282 = vmatprep.subr.mxu1 %v1681_v34 }
 0x27c   : > { %5258 = vmatprep.subr.mxu0 %v6382_v11 }
 0x27d   : > { %5259 = vmatpush3.msra.mxu0 %v6382_v11 }
 0x27e   : > { %5260 = vmatprep.subr.mxu0 %v6387_v13 }
 0x27f   : > { %5261 = vmatpush3.msra.mxu0 %v6387_v13  ;;  %v989_v13 = vadd.f32 %v5185_v49, %v4689_v5 }
 0x280   : > { %5262 = vmatprep.subr.mxu0 %v6394_v16 }
 0x281   : > { %5263 = vmatpush3.msra.mxu0 %v6394_v16  ;;  %v988_v16 = vadd.f32 %v4689_v5, %v6522_v50 }
 0x282   : > { %5264 = vmatprep.subr.mxu0 %v6401_v18 }
 0x283   : > { %5265 = vmatpush3.msra.mxu0 %v6401_v18 }
 0x284   : > { %5266 = vmatprep.subr.mxu0 %v6410_v20 }
 0x285   : > { %5267 = vmatpush3.msra.mxu0 %v6410_v20 }
 0x286   : > { %5269 = vmatmul.mubr.msk.f32.vlgmr.msra.gmra.mxu0 %vm781_vm1, %v6564_v0  ;;  %5296 = vmatprep.subr.mxu0 %v4754_v36 }
 0x287   : > { %5271 = vmatprep.mubr.msk.f32.mxu0 %vm781_vm1, %v4734_v1  ;;  %5297 = vmatpush3.msra.mxu0 %v4754_v36 }
 0x288   : > { %5298 = vmatprep.subr.mxu0 %v4753_v39 }
 0x289   : > { %5299 = vmatpush3.msra.mxu0 %v4753_v39 }
 0x28a   : > { %5272 = vmatmul.mubr.msk.f32.gmra.mxu0 %vm781_vm1, %v4735_v3  ;;  %vm1647_vm1 = vcmask 261120   ;;  %5300 = vmatprep.subr.mxu0 %v4752_v41 }
 0x28b   : > { %1649 = vst.msk [vmem:[#allocation2 + $0x8] sm:$0xff] %vm1647_vm1, %v6082_v6  ;;  %1650 = vst.msk [vmem:[#allocation2 + $0x10] sm:$0xff] %vm1647_vm1, %v6082_v6  ;;  %5301 = vmatpush3.msra.mxu0 %v4752_v41 }
 0x28c   : > { %1648 = vst.msk [vmem:[#allocation2] sm:$0xff] %vm1647_vm1, %v6082_v6  ;;  %1651 = vst.msk [vmem:[#allocation2 + $0x18] sm:$0xff] %vm1647_vm1, %v6082_v6  ;;  %5302 = vmatprep.subr.mxu0 %v4751_v44 }
 0x28d   : > { %5303 = vmatpush3.msra.mxu0 %v4751_v44 }
 0x322   : > { %v5214_v9 = vpop.f32.mrf.mxu0 }
 0x323   : > { %v1206_v11 = vadd.f32 %v5214_v9, %v987_v8 }
 0x324   : > { %v1186_v12 = vpop.f32.mrf.mxu0 }
 0x325   : > { %v1205_v14 = vadd.f32 %v1186_v12, %v986_v10 }
 0x326   : > { %v5217_v15 = vpop.f32.mrf.mxu0 }
 0x327   : > { %v1208_v17 = vadd.f32 %v5217_v15, %v989_v13 }
 0x328   : > { %v1196_v18 = vpop.f32.mrf.mxu0 }
 0x329   : > { %v1207_v19 = vadd.f32 %v1196_v18, %v988_v16 }
 0x334   : > { %v5246_v20 = vpop.f32.mrf.mxu0 }
 0x335   : > { %v1425_v22 = vadd.f32 %v5246_v20, %v1206_v11  ;;  %v4760_v11 = vld [vmem:[%s7057_s3 + $0x48] sm:$0xff] }
 0x336   : > { %v1405_v23 = vpop.f32.mrf.mxu0 }
 0x337   : > { %v1424_v24 = vadd.f32 %v1405_v23, %v1205_v14  ;;  %v4759_v14 = vld [vmem:[%s7057_s3 + $0x40] sm:$0xff]  ;;  %v2014_v23 = vld [vmem:[#allocation8 + $0x18] sm:$0xff] }
 0x338   : > { %v5249_v25 = vpop.f32.mrf.mxu0  ;;  %5324 = vmatprep.subr.mxu0 %v2014_v23 }
 0x339   : > { %v1427_v26 = vadd.f32 %v5249_v25, %v1208_v17  ;;  %v2012_v25 = vld [vmem:[#allocation8 + $0x8] sm:$0xff] }
 0x33a   : > { %v1415_v27 = vpop.f32.mrf.mxu0 }
 0x33b   : > { %v1426_v28 = vadd.f32 %v1415_v27, %v1207_v19 }
 0x346   : > { %v5270_v29 = vpop.f32.mrf.mxu0 }
 0x348   : > { %v1522_v31 = vpop.f32.mrf.mxu0 }
 0x349   : > { %5276 = vmatprep.mubr.msk.f32.mxu1 %vm884_vm7, %v1522_v31 }
 0x34a   : > { %v5273_v32 = vpop.f32.mrf.mxu0  ;;  %5277 = vmatmul.mubr.msk.f32.vlgmr.msra.gmra.mxu1 %vm884_vm7, %v5270_v29  ;;  %v4746_v29 = vld [vmem:[#allocation7] ss:$0 sm:$0xff] }
 0x34b   : > { %5283 = vmatpush3.msra.mxu1 %v1681_v34 }
 0x34c   : > { %v1532_v33 = vpop.f32.mrf.mxu0  ;;  %5284 = vmatprep.subr.mxu1 %v1680_v37 }
 0x34d   : > { %5279 = vmatprep.mubr.msk.f32.mxu1 %vm884_vm7, %v1532_v33  ;;  %5285 = vmatpush3.msra.mxu1 %v1680_v37 }
 0x34e   : > { %5280 = vmatmul.mubr.msk.f32.gmra.mxu1 %vm884_vm7, %v5273_v32  ;;  %5286 = vmatprep.subr.mxu1 %v1679_v40  ;;  %vm2613_vm7 = vcmask 277504  }
 0x34f   : > { %5287 = vmatpush3.msra.mxu1 %v1679_v40 }
 0x350   : > { %5288 = vmatprep.subr.mxu1 %v1678_v43 }
 0x351   : > { %5289 = vmatpush3.msra.mxu1 %v1678_v43 }
 0x352   : > { %5310 = vmatprep.subr.mxu1 %v4762_v45 }
 0x40a   : > { %v5278_v46 = vpop.f32.mrf.mxu1 }
 0x40b   : > { %v1644_v47 = vadd.f32 %v5278_v46, %v1425_v22 }
 0x40c   : > { %v1624_v48 = vpop.f32.mrf.mxu1 }
 0x40d   : > { %1655 = vst.msk [vmem:[#allocation2 + $0xb] sm:$0xff] %vm1647_vm1, %v1644_v47  ;;  %v1643_v49 = vadd.f32 %v1624_v48, %v1424_v24  ;;  %v2013_v24 = vld [vmem:[#allocation8 + $0x10] sm:$0xff] }
 0x40e   : > { %v5281_v50 = vpop.f32.mrf.mxu1 }
 0x40f   : > { %1654 = vst.msk [vmem:[#allocation2 + $0x3] sm:$0xff] %vm1647_vm1, %v1643_v49  ;;  %v1646_v51 = vadd.f32 %v5281_v50, %v1427_v26  ;;  %v2011_v26 = vld [vmem:[#allocation8] sm:$0xff] }
 0x410   : > { %v1634_v52 = vpop.f32.mrf.mxu1 }
 0x411   : > { %1657 = vst.msk [vmem:[#allocation2 + $0x1b] sm:$0xff] %vm1647_vm1, %v1646_v51  ;;  %v1645_v53 = vadd.f32 %v1634_v52, %v1426_v28 }
 0x413   : > { %1656 = vst.msk [vmem:[#allocation2 + $0x13] sm:$0xff] %vm1647_vm1, %v1645_v53 }
 0x414   : > { %v6623_v56 = vld [vmem:[#allocation2 + $0xb] sm:$0xff] }
 0x415   : > { %v1784_v62 = vmax.f32 %v6623_v56, 0.0 }
 0x416   : > { %v1671_v54 = vld [vmem:[#allocation2 + $0xa] sm:$0xff]  ;;  %v1670_v55 = vld [vmem:[#allocation2 + $0x2] sm:$0xff] }
 0x417   : > { %v1674_v57 = vmax.f32 %v1670_v55, 0.0  ;;  %v6625_v58 = vld [vmem:[#allocation2 + $0x3] sm:$0xff]  ;;  %v1675_v59 = vmax.f32 %v1671_v54, 0.0 }
 0x418   : > { %v1783_v61 = vmax.f32 %v6625_v58, 0.0  ;;  %v6633_v1 = vld [vmem:[#allocation2 + $0x1b] sm:$0xff]  ;;  %v1893_v8 = vld [vmem:[#allocation2 + $0x4] sm:$0xff] }
 0x419   : > { %5290 = vmatprep.mubr.msk.f32.mxu1 %vm1647_vm1, %v1674_v57  ;;  %v1786_v13 = vmax.f32 %v6633_v1, 0.0  ;;  %v1897_v15 = vmax.f32 %v1893_v8, 0.0  ;;  %v1896_v20 = vld [vmem:[#allocation2 + $0x1c] sm:$0xff]  ;;  %v4783_v8 = vld [vmem:[%s7057_s3 + $0x90] sm:$0xff] }
 0x41a   : > { %5304 = vmatprep.mubr.msk.f32.mxu0 %vm1647_vm1, %v1783_v61  ;;  %5291 = vmatmul.mubr.msk.f32.vlgmr.msra.gmra.mxu1 %vm1647_vm1, %v1675_v59  ;;  %v1672_v3 = vld [vmem:[#allocation2 + $0x12] sm:$0xff]  ;;  %v1673_v5 = vld [vmem:[#allocation2 + $0x1a] sm:$0xff]  ;;  %v1900_v22 = vmax.f32 %v1896_v20, 0.0 }
 0x41b   : > { %v6637_v4 = vld [vmem:[#allocation2 + $0x13] sm:$0xff]  ;;  %5305 = vmatmul.mubr.msk.f32.vlgmr.msra.gmra.mxu0 %vm1647_vm1, %v1784_v62  ;;  %5311 = vmatpush3.msra.mxu1 %v4762_v45  ;;  %v1676_v9 = vmax.f32 %v1672_v3, 0.0  ;;  %v1677_v12 = vmax.f32 %v1673_v5, 0.0 }
 0x41c   : > { %v1785_v10 = vmax.f32 %v6637_v4, 0.0  ;;  %5312 = vmatprep.subr.mxu1 %v4761_v63  ;;  %v1894_v16 = vld [vmem:[#allocation2 + $0xc] sm:$0xff]  ;;  %v1895_v17 = vld [vmem:[#allocation2 + $0x14] sm:$0xff]  ;;  %5325 = vmatpush3.msra.mxu0 %v2014_v23 }
 0x41d   : > { %5313 = vmatpush3.msra.mxu1 %v4761_v63  ;;  %5293 = vmatprep.mubr.msk.f32.mxu1 %vm1647_vm1, %v1676_v9  ;;  %v1898_v18 = vmax.f32 %v1894_v16, 0.0  ;;  %v1899_v19 = vmax.f32 %v1895_v17, 0.0  ;;  %v4776_v63 = vld [vmem:[%s7057_s3 + $0x78] sm:$0xff]  ;;  %v4775_v5 = vld [vmem:[%s7057_s3 + $0x70] sm:$0xff]  ;;  %v4774_v9 = vld [vmem:[%s7057_s3 + $0x68] sm:$0xff] }
 0x41e   : > { %5307 = vmatprep.mubr.msk.f32.mxu0 %vm1647_vm1, %v1785_v10  ;;  %5314 = vmatprep.subr.mxu1 %v4760_v11  ;;  %v4784_v3 = vld [vmem:[%s7057_s3 + $0x98] sm:$0xff]  ;;  %v4782_v10 = vld [vmem:[%s7057_s3 + $0x88] sm:$0xff] }
 0x41f   : > { %5294 = vmatmul.mubr.msk.f32.gmra.mxu1 %vm1647_vm1, %v1677_v12  ;;  %5308 = vmatmul.mubr.msk.f32.gmra.mxu0 %vm1647_vm1, %v1786_v13  ;;  %v4781_v12 = vld [vmem:[%s7057_s3 + $0x80] sm:$0xff]  ;;  %v4792_v13 = vld [vmem:[%s7057_s3 + $0xb8] sm:$0xff] }
 0x420   : > { %5315 = vmatpush3.msra.mxu1 %v4760_v11  ;;  %5318 = vmatprep.mubr.msk.f32.mxu1 %vm1647_vm1, %v1897_v15  ;;  %v4773_v11 = vld [vmem:[%s7057_s3 + $0x60] sm:$0xff] }
 0x421   : > { %5316 = vmatprep.subr.mxu1 %v4759_v14  ;;  %5326 = vmatprep.subr.mxu0 %v2013_v24 }
 0x422   : > { %5317 = vmatpush3.msra.mxu1 %v4759_v14  ;;  %5327 = vmatpush3.msra.mxu0 %v2013_v24  ;;  %v4767_v14 = vld [vmem:[#allocation10] ss:$0 sm:$0xff] }
 0x423   : > { %5319 = vmatmul.mubr.msk.f32.vlgmr.msra.gmra.mxu1 %vm1647_vm1, %v1898_v18  ;;  %5328 = vmatprep.subr.mxu0 %v2012_v25 }
 0x424   : > { %5321 = vmatprep.mubr.msk.f32.mxu1 %vm1647_vm1, %v1899_v19  ;;  %5329 = vmatpush3.msra.mxu0 %v2012_v25 }
 0x425   : > { %5330 = vmatprep.subr.mxu0 %v2011_v26  ;;  %5338 = vmatprep.subr.mxu1 %v4776_v63 }
 0x426   : > { %5331 = vmatpush3.msra.mxu0 %v2011_v26  ;;  %5339 = vmatpush3.msra.mxu1 %v4776_v63 }
 0x427   : > { %5322 = vmatmul.mubr.msk.f32.gmra.mxu1 %vm1647_vm1, %v1900_v22  ;;  %5352 = vmatprep.subr.mxu0 %v4784_v3 }
 0x428   : > { %5340 = vmatprep.subr.mxu1 %v4775_v5 }
 0x429   : > { %5341 = vmatpush3.msra.mxu1 %v4775_v5 }
 0x42a   : > { %5342 = vmatprep.subr.mxu1 %v4774_v9 }
 0x42b   : > { %5343 = vmatpush3.msra.mxu1 %v4774_v9 }
 0x42c   : > { %5344 = vmatprep.subr.mxu1 %v4773_v11 }
 0x42d   : > { %5345 = vmatpush3.msra.mxu1 %v4773_v11 }
 0x42e   : > { %5366 = vmatprep.subr.mxu1 %v4792_v13 }
 0x4da   : > { %v5292_v27 = vpop.f32.mrf.mxu1 }
 0x4db   : > { %v5306_v28 = vpop.f32.mrf.mxu0  ;;  %v1780_v32 = vadd.f32 %v5292_v27, %v4746_v29 }
 0x4dc   : > { %v1760_v31 = vpop.f32.mrf.mxu1 }
 0x4dd   : > { %v1870_v33 = vpop.f32.mrf.mxu0  ;;  %v1779_v36 = vadd.f32 %v4746_v29, %v1760_v31  ;;  %v1890_v39 = vadd.f32 %v5306_v28, %v1780_v32 }
 0x4df   : > { %v5295_v34 = vpop.f32.mrf.mxu1  ;;  %v5309_v41 = vpop.f32.mrf.mxu0  ;;  %v1889_v44 = vadd.f32 %v1870_v33, %v1779_v36 }
 0x4e0   : > { %v1782_v40 = vadd.f32 %v5295_v34, %v4746_v29 }
 0x4e1   : > { %v1770_v37 = vpop.f32.mrf.mxu1  ;;  %v1880_v50 = vpop.f32.mrf.mxu0 }
 0x4e2   : > { %v1781_v45 = vadd.f32 %v4746_v29, %v1770_v37  ;;  %v1892_v49 = vadd.f32 %v5309_v41, %v1782_v40 }
 0x4e3   : > { %v5320_v43 = vpop.f32.mrf.mxu1 }
 0x4e4   : > { %v2004_v46 = vadd.f32 %v5320_v43, %v1890_v39  ;;  %v1891_v52 = vadd.f32 %v1880_v50, %v1781_v45  ;;  %v4790_v43 = vld [vmem:[%s7057_s3 + $0xa8] sm:$0xff] }
 0x4e5   : > { %v1984_v47 = vpop.f32.mrf.mxu1 }
 0x4e6   : > { %v2003_v48 = vadd.f32 %v1984_v47, %v1889_v44  ;;  %v2008_v54 = vmax.f32 %v2004_v46, 0.0  ;;  %v4789_v47 = vld [vmem:[%s7057_s3 + $0xa0] sm:$0xff] }
 0x4e7   : > { %v5323_v51 = vpop.f32.mrf.mxu1 }
 0x4e8   : > { %v2007_v53 = vmax.f32 %v2003_v48, 0.0  ;;  %v2006_v55 = vadd.f32 %v5323_v51, %v1892_v49 }
 0x4e9   : > { %v1994_v57 = vpop.f32.mrf.mxu1 }
 0x4ea   : > { %v2005_v59 = vadd.f32 %v1994_v57, %v1891_v52  ;;  %5332 = vmatprep.mubr.msk.f32.mxu0 %vm1647_vm1, %v2007_v53  ;;  %v2010_v62 = vmax.f32 %v2006_v55, 0.0  ;;  %v2486_v55 = vld [vmem:[#allocation8 + $0x38] sm:$0xff]  ;;  %v2485_v57 = vld [vmem:[#allocation8 + $0x30] sm:$0xff] }
 0x4eb   : > { %5333 = vmatmul.mubr.msk.f32.vlgmr.msra.gmra.mxu0 %vm1647_vm1, %v2008_v54 }
 0x4ec   : > { %v2009_v61 = vmax.f32 %v2005_v59, 0.0  ;;  %5353 = vmatpush3.msra.mxu0 %v4784_v3  ;;  %v2484_v59 = vld [vmem:[#allocation8 + $0x28] sm:$0xff]  ;;  %v4772_v3 = vld [vmem:[#allocation7 + $0x1] ss:$0 sm:$0xff] }
 0x4ed   : > { %5354 = vmatprep.subr.mxu0 %v4783_v8 }
 0x4ee   : > { %5335 = vmatprep.mubr.msk.f32.mxu0 %vm1647_vm1, %v2009_v61  ;;  %5355 = vmatpush3.msra.mxu0 %v4783_v8  ;;  %v2483_v61 = vld [vmem:[#allocation8 + $0x20] sm:$0xff] }
 0x4ef   : > { %5336 = vmatmul.mubr.msk.f32.gmra.mxu0 %vm1647_vm1, %v2010_v62  ;;  %5356 = vmatprep.subr.mxu0 %v4782_v10 }
 0x4f0   : > { %5357 = vmatpush3.msra.mxu0 %v4782_v10 }
 0x4f1   : > { %5358 = vmatprep.subr.mxu0 %v4781_v12 }
 0x4f2   : > { %5359 = vmatpush3.msra.mxu0 %v4781_v12 }
 0x4f3   : > { %5380 = vmatprep.subr.mxu0 %v2486_v55 }
 0x5ab   : > { %v5334_v15 = vpop.f32.mrf.mxu0 }
 0x5ac   : > { %v2106_v16 = vadd.f32 %v5334_v15, %v4767_v14 }
 0x5ad   : > { %v2100_v17 = vpop.f32.mrf.mxu0 }
 0x5ae   : > { %v2120_v18 = vadd.f32 %v2106_v16, %v6623_v56  ;;  %v2101_v19 = vadd.f32 %v4767_v14, %v2100_v17 }
 0x5af   : > { %v5337_v20 = vpop.f32.mrf.mxu0 }
 0x5b0   : > { %2124 = vst.msk [vmem:[#allocation2 + $0xb] sm:$0xff] %vm1647_vm1, %v2120_v18  ;;  %v2119_v22 = vadd.f32 %v2101_v19, %v6625_v58  ;;  %v2116_v23 = vadd.f32 %v5337_v20, %v4767_v14 }
 0x5b1   : > { %v2110_v24 = vpop.f32.mrf.mxu0 }
 0x5b2   : > { %2123 = vst.msk [vmem:[#allocation2 + $0x3] sm:$0xff] %vm1647_vm1, %v2119_v22  ;;  %v2122_v25 = vadd.f32 %v2116_v23, %v6633_v1  ;;  %v2111_v26 = vadd.f32 %v4767_v14, %v2110_v24  ;;  %v4791_v1 = vld [vmem:[%s7057_s3 + $0xb0] sm:$0xff] }
 0x5b4   : > { %2126 = vst.msk [vmem:[#allocation2 + $0x1b] sm:$0xff] %vm1647_vm1, %v2122_v25  ;;  %v2121_v27 = vadd.f32 %v2111_v26, %v6637_v4 }
 0x5b6   : > { %2125 = vst.msk [vmem:[#allocation2 + $0x13] sm:$0xff] %vm1647_vm1, %v2121_v27 }
 0x5b7   : > { %v6695_v56 = vld [vmem:[#allocation2 + $0xb] sm:$0xff] }
 0x5b8   : > { %v2255_v34 = vmax.f32 %v6695_v56, 0.0 }
 0x5b9   : > { %v2140_v28 = vld [vmem:[#allocation2] sm:$0xff]  ;;  %v2141_v31 = vld [vmem:[#allocation2 + $0x8] sm:$0xff] }
 0x5ba   : > { %v6697_v29 = vld [vmem:[#allocation2 + $0x3] sm:$0xff]  ;;  %v2144_v58 = vmax.f32 %v2140_v28, 0.0  ;;  %v2145_v33 = vmax.f32 %v2141_v31, 0.0 }
 0x5bb   : > { %v2254_v32 = vmax.f32 %v6697_v29, 0.0  ;;  %v6706_v4 = vld [vmem:[#allocation2 + $0x1b] sm:$0xff]  ;;  %v2364_v45 = vld [vmem:[#allocation2 + $0x6] sm:$0xff] }
 0x5bc   : > { %5346 = vmatprep.mubr.msk.f32.mxu1 %vm1647_vm1, %v2144_v58  ;;  %v2257_v46 = vmax.f32 %v6706_v4, 0.0  ;;  %v2368_v48 = vmax.f32 %v2364_v45, 0.0  ;;  %v2367_v53 = vld [vmem:[#allocation2 + $0x1e] sm:$0xff] }
 0x5bd   : > { %5360 = vmatprep.mubr.msk.f32.mxu0 %vm1647_vm1, %v2254_v32  ;;  %5347 = vmatmul.mubr.msk.f32.vlgmr.msra.gmra.mxu1 %vm1647_vm1, %v2145_v33  ;;  %v2142_v36 = vld [vmem:[#allocation2 + $0x10] sm:$0xff]  ;;  %v2143_v39 = vld [vmem:[#allocation2 + $0x18] sm:$0xff]  ;;  %v2371_v54 = vmax.f32 %v2367_v53, 0.0  ;;  %v4812_v53 = vld [vmem:[%s7061_s7 + $0x28] sm:$0xff] }
 0x5be   : > { %5361 = vmatmul.mubr.msk.f32.vlgmr.msra.gmra.mxu0 %vm1647_vm1, %v2255_v34  ;;  %v6710_v37 = vld [vmem:[#allocation2 + $0x13] sm:$0xff]  ;;  %5367 = vmatpush3.msra.mxu1 %v4792_v13  ;;  %v2146_v40 = vmax.f32 %v2142_v36, 0.0  ;;  %v2147_v44 = vmax.f32 %v2143_v39, 0.0  ;;  %v4797_v39 = vld [vmem:[#allocation10 + $0x1] ss:$0 sm:$0xff] }
 0x5bf   : > { %v2256_v41 = vmax.f32 %v6710_v37, 0.0  ;;  %5368 = vmatprep.subr.mxu1 %v4791_v1  ;;  %v2365_v49 = vld [vmem:[#allocation2 + $0xe] sm:$0xff]  ;;  %v2366_v50 = vld [vmem:[#allocation2 + $0x16] sm:$0xff]  ;;  %5381 = vmatpush3.msra.mxu0 %v2486_v55 }
 0x5c0   : > { %5369 = vmatpush3.msra.mxu1 %v4791_v1  ;;  %5349 = vmatprep.mubr.msk.f32.mxu1 %vm1647_vm1, %v2146_v40  ;;  %v2369_v51 = vmax.f32 %v2365_v49, 0.0  ;;  %v2370_v52 = vmax.f32 %v2366_v50, 0.0  ;;  %v2699_v1 = vld [vmem:[%s7061_s7 + $0x18] sm:$0xff]  ;;  %v2698_v36 = vld [vmem:[%s7061_s7 + $0x10] sm:$0xff] }
 0x5c1   : > { %5363 = vmatprep.mubr.msk.f32.mxu0 %vm1647_vm1, %v2256_v41  ;;  %5370 = vmatprep.subr.mxu1 %v4790_v43  ;;  %v4823_v55 = vld [vmem:[%s7061_s7 + $0x58] sm:$0xff] }
 0x5c2   : > { %5350 = vmatmul.mubr.msk.f32.gmra.mxu1 %vm1647_vm1, %v2147_v44  ;;  %5364 = vmatmul.mubr.msk.f32.gmra.mxu0 %vm1647_vm1, %v2257_v46 }
 0x5c3   : > { %5371 = vmatpush3.msra.mxu1 %v4790_v43  ;;  %5374 = vmatprep.mubr.msk.f32.mxu1 %vm1647_vm1, %v2368_v48 }
 0x5c4   : > { %5372 = vmatprep.subr.mxu1 %v4789_v47  ;;  %5382 = vmatprep.subr.mxu0 %v2485_v57 }
 0x5c5   : > { %5373 = vmatpush3.msra.mxu1 %v4789_v47  ;;  %5383 = vmatpush3.msra.mxu0 %v2485_v57 }
 0x5c6   : > { %5375 = vmatmul.mubr.msk.f32.vlgmr.msra.gmra.mxu1 %vm1647_vm1, %v2369_v51  ;;  %5384 = vmatprep.subr.mxu0 %v2484_v59 }
 0x5c7   : > { %5377 = vmatprep.mubr.msk.f32.mxu1 %vm1647_vm1, %v2370_v52  ;;  %5385 = vmatpush3.msra.mxu0 %v2484_v59 }
 0x5c8   : > { %5386 = vmatprep.subr.mxu0 %v2483_v61 }
 0x5c9   : > { %5387 = vmatpush3.msra.mxu0 %v2483_v61  ;;  %v4822_v61 = vld [vmem:[%s7061_s7 + $0x50] sm:$0xff] }
 0x5ca   : > { %5378 = vmatmul.mubr.msk.f32.gmra.mxu1 %vm1647_vm1, %v2371_v54  ;;  %5407 = vmatprep.subr.mxu0 %v2699_v1  ;;  %v4811_v54 = vld [vmem:[%s7061_s7 + $0x20] sm:$0xff] }
 0x5cb   : > { %5404 = vmatprep.mubr.msk.f32.mxu1 %vm2613_vm7, %v6363_v7 }
 0x67d   : > { %v5348_v62 = vpop.f32.mrf.mxu1 }
 0x67e   : > { %v5362_v63 = vpop.f32.mrf.mxu0  ;;  %v2251_v8 = vadd.f32 %v5348_v62, %v4772_v3  ;;  %v4821_v62 = vld [vmem:[%s7061_s7 + $0x48] sm:$0xff] }
 0x67f   : > { %v2231_v5 = vpop.f32.mrf.mxu1 }
 0x680   : > { %v2341_v9 = vpop.f32.mrf.mxu0  ;;  %v2250_v11 = vadd.f32 %v4772_v3, %v2231_v5  ;;  %v2361_v13 = vadd.f32 %v5362_v63, %v2251_v8  ;;  %v4820_v63 = vld [vmem:[%s7061_s7 + $0x40] sm:$0xff]  ;;  %v4831_v8 = vld [vmem:[%s7061_s7 + $0x70] sm:$0xff] }
 0x682   : > { %v5351_v10 = vpop.f32.mrf.mxu1  ;;  %v5365_v15 = vpop.f32.mrf.mxu0  ;;  %v2360_v17 = vadd.f32 %v2341_v9, %v2250_v11  ;;  %v4830_v9 = vld [vmem:[%s7061_s7 + $0x68] sm:$0xff]  ;;  %v4802_v11 = vld [vmem:[#allocation11] ss:$0 sm:$0xff] }
 0x683   : > { %v2253_v14 = vadd.f32 %v5351_v10, %v4772_v3 }
 0x684   : > { %v2241_v12 = vpop.f32.mrf.mxu1  ;;  %v2351_v24 = vpop.f32.mrf.mxu0 }
 0x685   : > { %v2252_v18 = vadd.f32 %v4772_v3, %v2241_v12  ;;  %v2363_v23 = vadd.f32 %v5365_v15, %v2253_v14 }
 0x686   : > { %v5376_v16 = vpop.f32.mrf.mxu1 }
 0x687   : > { %v2475_v19 = vadd.f32 %v5376_v16, %v2361_v13  ;;  %v2362_v26 = vadd.f32 %v2351_v24, %v2252_v18 }
 0x688   : > { %v2455_v20 = vpop.f32.mrf.mxu1 }
 0x689   : > { %v2474_v22 = vadd.f32 %v2455_v20, %v2360_v17  ;;  %v2479_v28 = vmax.f32 %v2475_v19, 0.0 }
 0x68a   : > { %v5379_v25 = vpop.f32.mrf.mxu1 }
 0x68b   : > { %v2478_v27 = vmax.f32 %v2474_v22, 0.0  ;;  %v2477_v31 = vadd.f32 %v5379_v25, %v2363_v23 }
 0x68c   : > { %v2465_v58 = vpop.f32.mrf.mxu1 }
 0x68d   : > { %v2476_v32 = vadd.f32 %v2465_v58, %v2362_v26  ;;  %5388 = vmatprep.mubr.msk.f32.mxu0 %vm1647_vm1, %v2478_v27  ;;  %v2481_v34 = vmax.f32 %v2477_v31, 0.0  ;;  %v3308_v26 = vld [vmem:[%s7063_s9 + $0x18] sm:$0xff]  ;;  %v4840_v31 = vld [vmem:[%s7063_s9 + $0x30] sm:$0xff]  ;;  %v3306_v58 = vld [vmem:[%s7063_s9 + $0x8] sm:$0xff] }
 0x68e   : > { %5389 = vmatmul.mubr.msk.f32.vlgmr.msra.gmra.mxu0 %vm1647_vm1, %v2479_v28  ;;  %v4841_v27 = vld [vmem:[%s7063_s9 + $0x38] sm:$0xff]  ;;  %v3307_v28 = vld [vmem:[%s7063_s9 + $0x10] sm:$0xff] }
 0x68f   : > { %v2480_v33 = vmax.f32 %v2476_v32, 0.0  ;;  %5408 = vmatpush3.msra.mxu0 %v2699_v1  ;;  %v4839_v32 = vld [vmem:[%s7063_s9 + $0x28] sm:$0xff]  ;;  %v4847_v1 = vld [vmem:[%s7063_s9 + $0x58] sm:$0xff] }
 0x690   : > { %5409 = vmatprep.subr.mxu0 %v2698_v36 }
 0x691   : > { %5391 = vmatprep.mubr.msk.f32.mxu0 %vm1647_vm1, %v2480_v33  ;;  %5410 = vmatpush3.msra.mxu0 %v2698_v36  ;;  %v3305_v33 = vld [vmem:[%s7063_s9] sm:$0xff] }
 0x692   : > { %5392 = vmatmul.mubr.msk.f32.gmra.mxu0 %vm1647_vm1, %v2481_v34  ;;  %v4838_v34 = vld [vmem:[%s7063_s9 + $0x20] sm:$0xff] }
 0x74e   : > { %v5390_v40 = vpop.f32.mrf.mxu0 }
 0x74f   : > { %v2579_v41 = vadd.f32 %v5390_v40, %v4797_v39 }
 0x750   : > { %v2573_v43 = vpop.f32.mrf.mxu0 }
 0x751   : > { %v2593_v44 = vadd.f32 %v2579_v41, %v6695_v56  ;;  %v2574_v45 = vadd.f32 %v4797_v39, %v2573_v43 }
 0x752   : > { %v5393_v7 = vpop.f32.mrf.mxu0 }
 0x753   : > { %2597 = vst.msk [vmem:[#allocation2 + $0xb] sm:$0xff] %vm1647_vm1, %v2593_v44  ;;  %v2592_v46 = vadd.f32 %v2574_v45, %v6697_v29  ;;  %v2589_v47 = vadd.f32 %v5393_v7, %v4797_v39 }
 0x754   : > { %v2583_v48 = vpop.f32.mrf.mxu0 }
 0x755   : > { %2596 = vst.msk [vmem:[#allocation2 + $0x3] sm:$0xff] %vm1647_vm1, %v2592_v46  ;;  %v2595_v49 = vadd.f32 %v2589_v47, %v6706_v4  ;;  %v2584_v50 = vadd.f32 %v4797_v39, %v2583_v48 }
 0x757   : > { %2599 = vst.msk [vmem:[#allocation2 + $0x1b] sm:$0xff] %vm1647_vm1, %v2595_v49  ;;  %v2594_v51 = vadd.f32 %v2584_v50, %v6710_v37 }
 0x759   : > { %2598 = vst.msk [vmem:[#allocation2 + $0x13] sm:$0xff] %vm1647_vm1, %v2594_v51  ;;  %v4846_v51 = vld [vmem:[%s7063_s9 + $0x50] sm:$0xff] }
 0x75c   : > { %v6748_v56 = vld [vmem:[#allocation2 + $0xa] sm:$0xff]  ;;  %v6750_v52 = vld [vmem:[#allocation2 + $0x2] sm:$0xff] }
 0x75d   : > { %3284 = vst.msk [vmem:[#allocation2] sm:$0xff] %vm1647_vm1, %v6082_v6  ;;  %3285 = vst.msk [vmem:[#allocation2 + $0x8] sm:$0xff] %vm1647_vm1, %v6082_v6 }
 0x75e   : > { %v6756_v29 = vld [vmem:[#allocation2 + $0x22] sm:$0x3] }
 0x75f   : > { %5394 = vmatprep.subr.msk.mxu1 %vm794_vm0, %v6756_v29 }
 0x760   : > { %5395 = vmatpush3.msk.msra.mxu1 %vm794_vm0, %v6756_v29  ;;  %v6762_v4 = vld [vmem:[#allocation2 + $0x1a] sm:$0xff]  ;;  %v6764_v37 = vld [vmem:[#allocation2 + $0x12] sm:$0xff] }
 0x761   : > { %5396 = vmatprep.subr.mxu1 %v6762_v4  ;;  %3288 = vst.msk [vmem:[#allocation2 + $0x20] sm:$0x3f] %vm1652_vm6, %v6082_v6 }
 0x762   : > { %3287 = vst.msk [vmem:[#allocation2 + $0x18] sm:$0xff] %vm1647_vm1, %v6082_v6  ;;  %3286 = vst.msk [vmem:[#allocation2 + $0x10] sm:$0xff] %vm1647_vm1, %v6082_v6  ;;  %5397 = vmatpush3.msra.mxu1 %v6762_v4  ;;  %v2697_v6 = vld [vmem:[%s7061_s7 + $0x8] sm:$0xff] }
 0x763   : > { %5398 = vmatprep.subr.mxu1 %v6764_v37  ;;  %5411 = vmatprep.subr.mxu0 %v2697_v6 }
 0x764   : > { %5399 = vmatpush3.msra.mxu1 %v6764_v37  ;;  %5412 = vmatpush3.msra.mxu0 %v2697_v6  ;;  %v3579_v6 = vld [vmem:[#allocation14 + $0x18] sm:$0xff] }
 0x765   : > { %5400 = vmatprep.subr.mxu1 %v6748_v56 }
 0x766   : > { %5401 = vmatpush3.msra.mxu1 %v6748_v56 }
 0x767   : > { %5402 = vmatprep.subr.mxu1 %v6750_v52 }
 0x768   : > { %5403 = vmatpush3.msra.mxu1 %v6750_v52 }
 0x769   : > { %5405 = vmatmul.mubr.msk.f32.vlgmr.msra.gmra.mxu1 %vm2613_vm7, %v6417_v21  ;;  %5418 = vmatprep.subr.msk.mxu1 %vm794_vm0, %v6756_v29  ;;  %v2696_v21 = vld [vmem:[%s7061_s7] sm:$0xff] }
 0x76a   : > { %5419 = vmatpush3.msk.msra.mxu1 %vm794_vm0, %v6756_v29  ;;  %5428 = vmatprep.mubr.msk.f32.mxu1 %vm2613_vm7, %v6441_v30  ;;  %v4814_v30 = vld [vmem:[%s7061_s7 + $0x38] sm:$0xff] }
 0x76b   : > { %5420 = vmatprep.subr.mxu1 %v6762_v4  ;;  %5413 = vmatprep.subr.mxu0 %v2696_v21 }
 0x76c   : > { %5421 = vmatpush3.msra.mxu1 %v6762_v4  ;;  %5414 = vmatpush3.msra.mxu0 %v2696_v21  ;;  %v3578_v21 = vld [vmem:[#allocation14 + $0x10] sm:$0xff] }
 0x76d   : > { %5422 = vmatprep.subr.mxu1 %v6764_v37  ;;  %5431 = vmatprep.subr.mxu0 %v4814_v30 }
 0x76e   : > { %5423 = vmatpush3.msra.mxu1 %v6764_v37 }
 0x76f   : > { %5424 = vmatprep.subr.mxu1 %v6748_v56 }
 0x770   : > { %5425 = vmatpush3.msra.mxu1 %v6748_v56 }
 0x771   : > { %5426 = vmatprep.subr.mxu1 %v6750_v52 }
 0x772   : > { %5427 = vmatpush3.msra.mxu1 %v6750_v52 }
 0x773   : > { %5429 = vmatmul.mubr.msk.f32.vlgmr.msra.gmra.mxu1 %vm2613_vm7, %v6467_v35  ;;  %5442 = vmatprep.subr.msk.mxu1 %vm794_vm0, %v6756_v29 }
 0x774   : > { %5443 = vmatpush3.msk.msra.mxu1 %vm794_vm0, %v6756_v29  ;;  %5452 = vmatprep.mubr.msk.f32.mxu1 %vm2613_vm7, %v6484_v38 }
 0x775   : > { %5444 = vmatprep.subr.mxu1 %v6762_v4 }
 0x776   : > { %5445 = vmatpush3.msra.mxu1 %v6762_v4 }
 0x777   : > { %5446 = vmatprep.subr.mxu1 %v6764_v37 }
 0x778   : > { %5447 = vmatpush3.msra.mxu1 %v6764_v37 }
 0x779   : > { %5448 = vmatprep.subr.mxu1 %v6748_v56 }
 0x77a   : > { %5449 = vmatpush3.msra.mxu1 %v6748_v56 }
 0x77b   : > { %5450 = vmatprep.subr.mxu1 %v6750_v52 }
 0x77c   : > { %5451 = vmatpush3.msra.mxu1 %v6750_v52 }
 0x77d   : > { %5453 = vmatmul.mubr.msk.f32.vlgmr.msra.gmra.mxu1 %vm2613_vm7, %v6508_v42  ;;  %v4813_v42 = vld [vmem:[%s7061_s7 + $0x30] sm:$0xff] }
 0x829   : > { %v5406_v35 = vpop.f32.mrf.mxu1 }
 0x82b   : > { %v2687_v38 = vpop.f32.mrf.mxu1 }
 0x82c   : > { %5415 = vmatprep.mubr.msk.f32.mxu0 %vm1647_vm1, %v2687_v38 }
 0x82d   : > { %5416 = vmatmul.mubr.msk.f32.vlgmr.msra.gmra.mxu0 %vm1647_vm1, %v5406_v35  ;;  %v3576_v35 = vld [vmem:[#allocation14] sm:$0xff] }
 0x82e   : > { %5432 = vmatpush3.msra.mxu0 %v4814_v30  ;;  %v3577_v30 = vld [vmem:[#allocation14 + $0x8] sm:$0xff] }
 0x82f   : > { %5433 = vmatprep.subr.mxu0 %v4813_v42 }
 0x830   : > { %5434 = vmatpush3.msra.mxu0 %v4813_v42  ;;  %v4835_v42 = vld [vmem:[#allocation13] ss:$0 sm:$0xff] }
 0x831   : > { %5435 = vmatprep.subr.mxu0 %v4812_v53 }
 0x832   : > { %5436 = vmatpush3.msra.mxu0 %v4812_v53 }
 0x833   : > { %v5430_v57 = vpop.f32.mrf.mxu1  ;;  %5437 = vmatprep.subr.mxu0 %v4811_v54 }
 0x834   : > { %5438 = vmatpush3.msra.mxu0 %v4811_v54 }
 0x835   : > { %v2853_v59 = vpop.f32.mrf.mxu1  ;;  %5455 = vmatprep.subr.mxu0 %v4823_v55 }
 0x836   : > { %5439 = vmatprep.mubr.msk.f32.mxu0 %vm1647_vm1, %v2853_v59 }
 0x837   : > { %5440 = vmatmul.mubr.msk.f32.vlgmr.msra.gmra.mxu0 %vm1647_vm1, %v5430_v57 }
 0x838   : > { %5456 = vmatpush3.msra.mxu0 %v4823_v55 }
 0x839   : > { %5457 = vmatprep.subr.mxu0 %v4822_v61 }
 0x83a   : > { %5458 = vmatpush3.msra.mxu0 %v4822_v61 }
 0x83b   : > { %5459 = vmatprep.subr.mxu0 %v4821_v62 }
 0x83c   : > { %5460 = vmatpush3.msra.mxu0 %v4821_v62 }
 0x83d   : > { %5461 = vmatprep.subr.mxu0 %v4820_v63  ;;  %v5454_v3 = vpop.f32.mrf.mxu1 }
 0x83e   : > { %5462 = vmatpush3.msra.mxu0 %v4820_v63 }
 0x83f   : > { %5466 = vmatprep.subr.msk.mxu0 %vm794_vm0, %v6756_v29  ;;  %v3020_v5 = vpop.f32.mrf.mxu1 }
 0x840   : > { %5463 = vmatprep.mubr.msk.f32.mxu0 %vm1647_vm1, %v3020_v5 }
 0x841   : > { %5464 = vmatmul.mubr.msk.f32.vlgmr.msra.gmra.mxu0 %vm1647_vm1, %v5454_v3 }
 0x842   : > { %5467 = vmatpush3.msk.msra.mxu0 %vm794_vm0, %v6756_v29  ;;  %5476 = vmatprep.mubr.msk.f32.mxu0 %vm2613_vm7, %v6539_v60  ;;  %v4832_v60 = vld [vmem:[%s7061_s7 + $0x78] sm:$0xff]  ;;  %v4844_v29 = vld [vmem:[%s7063_s9 + $0x40] sm:$0xff]  ;;  %vm4334_vm0 = vcmask 64512  }
 0x843   : > { %5468 = vmatprep.subr.mxu0 %v6762_v4  ;;  %5479 = vmatprep.subr.mxu1 %v4832_v60 }
 0x844   : > { %5469 = vmatpush3.msra.mxu0 %v6762_v4  ;;  %5480 = vmatpush3.msra.mxu1 %v4832_v60 }
 0x845   : > { %5470 = vmatprep.subr.mxu0 %v6764_v37  ;;  %5481 = vmatprep.subr.mxu1 %v4831_v8 }
 0x846   : > { %5471 = vmatpush3.msra.mxu0 %v6764_v37  ;;  %5482 = vmatpush3.msra.mxu1 %v4831_v8 }
 0x847   : > { %5472 = vmatprep.subr.mxu0 %v6748_v56  ;;  %5483 = vmatprep.subr.mxu1 %v4830_v9 }
 0x848   : > { %5473 = vmatpush3.msra.mxu0 %v6748_v56  ;;  %5484 = vmatpush3.msra.mxu1 %v4830_v9 }
 0x849   : > { %5474 = vmatprep.subr.mxu0 %v6750_v52 }
 0x84a   : > { %5475 = vmatpush3.msra.mxu0 %v6750_v52  ;;  %v4845_v52 = vld [vmem:[%s7063_s9 + $0x48] sm:$0xff] }
 0x84b   : > { %5477 = vmatmul.mubr.msk.f32.vlgmr.msra.gmra.mxu0 %vm2613_vm7, %v6564_v0  ;;  %v4829_v0 = vld [vmem:[%s7061_s7 + $0x60] sm:$0xff]  ;;  %5501 = vmatprep.subr.mxu0 %v4841_v27 }
 0x84c   : > { %5485 = vmatprep.subr.mxu1 %v4829_v0  ;;  %5502 = vmatpush3.msra.mxu0 %v4841_v27 }
 0x84d   : > { %5486 = vmatpush3.msra.mxu1 %v4829_v0  ;;  %5503 = vmatprep.subr.mxu0 %v4840_v31  ;;  %v4857_v0 = vld [vmem:[%s7063_s9 + $0x78] sm:$0xff] }
 0x84e   : > { %5490 = vmatprep.subr.mxu1 %v3308_v26  ;;  %5504 = vmatpush3.msra.mxu0 %v4840_v31 }
 0x84f   : > { %5505 = vmatprep.subr.mxu0 %v4839_v32 }
 0x850   : > { %5506 = vmatpush3.msra.mxu0 %v4839_v32 }
 0x851   : > { %5507 = vmatprep.subr.mxu0 %v4838_v34 }
 0x852   : > { %5508 = vmatpush3.msra.mxu0 %v4838_v34 }
 0x853   : > { %5523 = vmatprep.subr.mxu0 %v3579_v6 }
 0x8ed   : > { %v5417_v10 = vpop.f32.mrf.mxu0 }
 0x8ee   : > { %v2782_v13 = vadd.f32 %v5417_v10, %v4802_v11  ;;  %v4863_v10 = vld [vmem:[%s7063_s9 + $0x98] sm:$0xff] }
 0x8ef   : > { %v2772_v12 = vpop.f32.mrf.mxu0 }
 0x8f0   : > { %v2781_v15 = vadd.f32 %v4802_v11, %v2772_v12  ;;  %v4856_v11 = vld [vmem:[%s7063_s9 + $0x70] sm:$0xff] }
 0x8f1   : > { %v4862_v12 = vld [vmem:[%s7063_s9 + $0x90] sm:$0xff] }
 0x8f7   : > { %v5441_v14 = vpop.f32.mrf.mxu0 }
 0x8f8   : > { %v2949_v16 = vadd.f32 %v5441_v14, %v2782_v13  ;;  %v4855_v13 = vld [vmem:[%s7063_s9 + $0x68] sm:$0xff] }
 0x8f9   : > { %v2939_v17 = vpop.f32.mrf.mxu0  ;;  %v4861_v14 = vld [vmem:[%s7063_s9 + $0x88] sm:$0xff] }
 0x8fa   : > { %v2948_v18 = vadd.f32 %v2939_v17, %v2781_v15  ;;  %v4854_v15 = vld [vmem:[%s7063_s9 + $0x60] sm:$0xff]  ;;  %v4869_v17 = vld [vmem:[%s7063_s9 + $0xb8] sm:$0xff] }
 0x901   : > { %v5465_v19 = vpop.f32.mrf.mxu0 }
 0x902   : > { %v3116_v20 = vadd.f32 %v5465_v19, %v2949_v16  ;;  %v4860_v16 = vld [vmem:[%s7063_s9 + $0x80] sm:$0xff] }
 0x903   : > { %v3106_v22 = vpop.f32.mrf.mxu0 }
 0x904   : > { %v3115_v23 = vadd.f32 %v3106_v22, %v2948_v18  ;;  %v4850_v18 = vld [vmem:[#allocation16] ss:$0 sm:$0xff] }
 0x90b   : > { %v5478_v24 = vpop.f32.mrf.mxu0 }
 0x90d   : > { %v3187_v25 = vpop.f32.mrf.mxu0 }
 0x90e   : > { %5487 = vmatprep.mubr.msk.f32.mxu1 %vm1647_vm1, %v3187_v25 }
 0x90f   : > { %5488 = vmatmul.mubr.msk.f32.vlgmr.msra.gmra.mxu1 %vm1647_vm1, %v5478_v24 }
 0x910   : > { %5491 = vmatpush3.msra.mxu1 %v3308_v26 }
 0x911   : > { %5492 = vmatprep.subr.mxu1 %v3307_v28 }
 0x912   : > { %5493 = vmatpush3.msra.mxu1 %v3307_v28 }
 0x913   : > { %5494 = vmatprep.subr.mxu1 %v3306_v58 }
 0x914   : > { %5495 = vmatpush3.msra.mxu1 %v3306_v58 }
 0x915   : > { %5496 = vmatprep.subr.mxu1 %v3305_v33 }
 0x916   : > { %5497 = vmatpush3.msra.mxu1 %v3305_v33 }
 0x917   : > { %5512 = vmatprep.subr.mxu1 %v4847_v1 }
 0x9cf   : > { %v5489_v36 = vpop.f32.mrf.mxu1 }
 0x9d0   : > { %v3283_v39 = vadd.f32 %v5489_v36, %v3116_v20  ;;  %v4868_v36 = vld [vmem:[%s7063_s9 + $0xb0] sm:$0xff] }
 0x9d1   : > { %v3273_v40 = vpop.f32.mrf.mxu1 }
 0x9d2   : > { %3290 = vst.msk [vmem:[#allocation2 + $0xb] sm:$0xff] %vm1647_vm1, %v3283_v39  ;;  %v3282_v41 = vadd.f32 %v3273_v40, %v3115_v23  ;;  %v4867_v40 = vld [vmem:[%s7063_s9 + $0xa8] sm:$0xff] }
 0x9d4   : > { %3289 = vst.msk [vmem:[#allocation2 + $0x3] sm:$0xff] %vm1647_vm1, %v3282_v41  ;;  %v4866_v41 = vld [vmem:[%s7063_s9 + $0xa0] sm:$0xff] }
 0x9d9   : > { %v6909_v43 = vld [vmem:[#allocation2 + $0xb] sm:$0xff] }
 0x9da   : > { %v3393_v50 = vmax.f32 %v6909_v43, 0.0  ;;  %v3483_v4 = vld [vmem:[#allocation2 + $0xc] sm:$0xff] }
 0x9db   : > { %v3301_v44 = vld [vmem:[#allocation2 + $0x2] sm:$0xff]  ;;  %v3302_v7 = vld [vmem:[#allocation2 + $0xa] sm:$0xff]  ;;  %v3485_v37 = vmax.f32 %v3483_v4, 0.0 }
 0x9dc   : > { %v6911_v45 = vld [vmem:[#allocation2 + $0x3] sm:$0xff]  ;;  %v3303_v46 = vmax.f32 %v3301_v44, 0.0  ;;  %v3304_v48 = vmax.f32 %v3302_v7, 0.0  ;;  %v3962_v7 = vld [vmem:[#allocation14 + $0x30] sm:$0xff] }
 0x9dd   : > { %v3392_v47 = vmax.f32 %v6911_v45, 0.0  ;;  %v3482_v49 = vld [vmem:[#allocation2 + $0x4] sm:$0xff] }
 0x9de   : > { %5498 = vmatprep.mubr.msk.f32.mxu1 %vm1647_vm1, %v3303_v46  ;;  %v3484_v56 = vmax.f32 %v3482_v49, 0.0  ;;  %v3961_v46 = vld [vmem:[#allocation14 + $0x28] sm:$0xff]  ;;  %v4853_v49 = vld [vmem:[#allocation13 + $0x1] ss:$0 sm:$0xff] }
 0x9df   : > { %5509 = vmatprep.mubr.msk.f32.mxu0 %vm1647_vm1, %v3392_v47  ;;  %5499 = vmatmul.mubr.msk.f32.vlgmr.msra.gmra.mxu1 %vm1647_vm1, %v3304_v48  ;;  %v3960_v47 = vld [vmem:[#allocation14 + $0x20] sm:$0xff] }
 0x9e0   : > { %5510 = vmatmul.mubr.msk.f32.vlgmr.msra.gmra.mxu0 %vm1647_vm1, %v3393_v50  ;;  %5513 = vmatpush3.msra.mxu1 %v4847_v1 }
 0x9e1   : > { %5520 = vmatprep.mubr.msk.f32.mxu1 %vm1647_vm1, %v3484_v56  ;;  %5514 = vmatprep.subr.mxu1 %v4846_v51 }
 0x9e2   : > { %5515 = vmatpush3.msra.mxu1 %v4846_v51  ;;  %5524 = vmatpush3.msra.mxu0 %v3579_v6 }
 0x9e3   : > { %5516 = vmatprep.subr.mxu1 %v4845_v52  ;;  %5525 = vmatprep.subr.mxu0 %v3578_v21 }
 0x9e4   : > { %5517 = vmatpush3.msra.mxu1 %v4845_v52  ;;  %5526 = vmatpush3.msra.mxu0 %v3578_v21 }
 0x9e5   : > { %5518 = vmatprep.subr.mxu1 %v4844_v29  ;;  %5527 = vmatprep.subr.mxu0 %v3577_v30 }
 0x9e6   : > { %5519 = vmatpush3.msra.mxu1 %v4844_v29  ;;  %5528 = vmatpush3.msra.mxu0 %v3577_v30 }
 0x9e7   : > { %5521 = vmatmul.mubr.msk.f32.vlgmr.msra.gmra.mxu1 %vm1647_vm1, %v3485_v37  ;;  %5529 = vmatprep.subr.mxu0 %v3576_v35 }
 0x9e8   : > { %5530 = vmatpush3.msra.mxu0 %v3576_v35  ;;  %5534 = vmatprep.subr.mxu1 %v4857_v0 }
 0x9e9   : > { %5545 = vmatprep.subr.mxu0 %v4863_v10  ;;  %5535 = vmatpush3.msra.mxu1 %v4857_v0 }
 0x9ea   : > { %5536 = vmatprep.subr.mxu1 %v4856_v11 }
 0x9eb   : > { %5537 = vmatpush3.msra.mxu1 %v4856_v11 }
 0x9ec   : > { %5538 = vmatprep.subr.mxu1 %v4855_v13 }
 0x9ed   : > { %5539 = vmatpush3.msra.mxu1 %v4855_v13 }
 0x9ee   : > { %5540 = vmatprep.subr.mxu1 %v4854_v15 }
 0x9ef   : > { %5541 = vmatpush3.msra.mxu1 %v4854_v15 }
 0x9f0   : > { %5556 = vmatprep.subr.mxu1 %v4869_v17 }
 0xa9f   : > { %v5500_v38 = vpop.f32.mrf.mxu1 }
 0xaa0   : > { %v3391_v54 = vadd.f32 %v5500_v38, %v4835_v42  ;;  %v5511_v55 = vpop.f32.mrf.mxu0 }
 0xaa1   : > { %v3381_v53 = vpop.f32.mrf.mxu1 }
 0xaa2   : > { %v3390_v57 = vadd.f32 %v4835_v42, %v3381_v53  ;;  %v3481_v59 = vadd.f32 %v5511_v55, %v3391_v54  ;;  %v3471_v61 = vpop.f32.mrf.mxu0  ;;  %v4070_v53 = vld [vmem:[%s7067_s13 + $0x18] sm:$0xff]  ;;  %v4069_v55 = vld [vmem:[%s7067_s13 + $0x10] sm:$0xff] }
 0xaa3   : > { %v4881_v54 = vld [vmem:[%s7067_s13 + $0x38] sm:$0xff] }
 0xaa4   : > { %v3480_v63 = vadd.f32 %v3471_v61, %v3390_v57  ;;  %v4880_v57 = vld [vmem:[%s7067_s13 + $0x30] sm:$0xff]  ;;  %v4879_v61 = vld [vmem:[%s7067_s13 + $0x28] sm:$0xff] }
 0xaa7   : > { %v5522_v62 = vpop.f32.mrf.mxu1 }
 0xaa8   : > { %v3573_v3 = vadd.f32 %v5522_v62, %v3481_v59  ;;  %v4068_v59 = vld [vmem:[%s7067_s13 + $0x8] sm:$0xff]  ;;  %v4067_v62 = vld [vmem:[%s7067_s13] sm:$0xff] }
 0xaa9   : > { %v3563_v5 = vpop.f32.mrf.mxu1 }
 0xaaa   : > { %v3572_v60 = vadd.f32 %v3563_v5, %v3480_v63  ;;  %v3575_v9 = vmax.f32 %v3573_v3, 0.0  ;;  %v4878_v63 = vld [vmem:[%s7067_s13 + $0x20] sm:$0xff]  ;;  %v4887_v3 = vld [vmem:[%s7067_s13 + $0x58] sm:$0xff] }
 0xaab   : > { %v4872_v5 = vld [vmem:[#allocation16 + $0x1] ss:$0 sm:$0xff] }
 0xaac   : > { %v3574_v8 = vmax.f32 %v3572_v60, 0.0 }
 0xaae   : > { %5531 = vmatprep.mubr.msk.f32.mxu0 %vm1647_vm1, %v3574_v8 }
 0xaaf   : > { %5532 = vmatmul.mubr.msk.f32.vlgmr.msra.gmra.mxu0 %vm1647_vm1, %v3575_v9 }
 0xab0   : > { %5546 = vmatpush3.msra.mxu0 %v4863_v10 }
 0xab1   : > { %5547 = vmatprep.subr.mxu0 %v4862_v12 }
 0xab2   : > { %5548 = vmatpush3.msra.mxu0 %v4862_v12 }
 0xab3   : > { %5549 = vmatprep.subr.mxu0 %v4861_v14 }
 0xab4   : > { %5550 = vmatpush3.msra.mxu0 %v4861_v14 }
 0xab5   : > { %5551 = vmatprep.subr.mxu0 %v4860_v16 }
 0xab6   : > { %5552 = vmatpush3.msra.mxu0 %v4860_v16  ;;  %v4886_v16 = vld [vmem:[%s7067_s13 + $0x50] sm:$0xff] }
 0xb6f   : > { %v5533_v19 = vpop.f32.mrf.mxu0 }
 0xb70   : > { %v3665_v20 = vadd.f32 %v5533_v19, %v4850_v18  ;;  %v4884_v19 = vld [vmem:[%s7067_s13 + $0x40] sm:$0xff] }
 0xb71   : > { %v3659_v22 = vpop.f32.mrf.mxu0 }
 0xb72   : > { %v3669_v23 = vadd.f32 %v3665_v20, %v6909_v43  ;;  %v3660_v24 = vadd.f32 %v4850_v18, %v3659_v22  ;;  %v4885_v18 = vld [vmem:[%s7067_s13 + $0x48] sm:$0xff]  ;;  %v4337_v22 = vld [vmem:[%s7069_s15] sm:$0xff] }
 0xb74   : > { %3671 = vst.msk [vmem:[#allocation2 + $0xb] sm:$0xff] %vm1647_vm1, %v3669_v23  ;;  %v3668_v25 = vadd.f32 %v3660_v24, %v6911_v45  ;;  %v3963_v45 = vld [vmem:[#allocation14 + $0x38] sm:$0xff]  ;;  %v4875_v23 = vld [vmem:[#allocation17] ss:$0 sm:$0xff] }
 0xb75   : > { %5567 = vmatprep.subr.mxu0 %v3963_v45 }
 0xb76   : > { %3670 = vst.msk [vmem:[#allocation2 + $0x3] sm:$0xff] %vm1647_vm1, %v3668_v25 }
 0xb7b   : > { %v6963_v26 = vld [vmem:[#allocation2 + $0xb] sm:$0xff] }
 0xb7c   : > { %v3776_v1 = vmax.f32 %v6963_v26, 0.0  ;;  %v3866_v43 = vld [vmem:[#allocation2 + $0xe] sm:$0xff] }
 0xb7d   : > { %v3683_v27 = vld [vmem:[#allocation2] sm:$0xff]  ;;  %v3684_v31 = vld [vmem:[#allocation2 + $0x8] sm:$0xff]  ;;  %v3868_v44 = vmax.f32 %v3866_v43, 0.0 }
 0xb7e   : > { %v6965_v28 = vld [vmem:[#allocation2 + $0x3] sm:$0xff]  ;;  %v3685_v58 = vmax.f32 %v3683_v27, 0.0  ;;  %v3686_v33 = vmax.f32 %v3684_v31, 0.0 }
 0xb7f   : > { %v3775_v32 = vmax.f32 %v6965_v28, 0.0  ;;  %v3865_v34 = vld [vmem:[#allocation2 + $0x6] sm:$0xff] }
 0xb80   : > { %5542 = vmatprep.mubr.msk.f32.mxu1 %vm1647_vm1, %v3685_v58  ;;  %v3867_v39 = vmax.f32 %v3865_v34, 0.0 }
 0xb81   : > { %5553 = vmatprep.mubr.msk.f32.mxu0 %vm1647_vm1, %v3775_v32  ;;  %5543 = vmatmul.mubr.msk.f32.vlgmr.msra.gmra.mxu1 %vm1647_vm1, %v3686_v33 }
 0xb82   : > { %5554 = vmatmul.mubr.msk.f32.vlgmr.msra.gmra.mxu0 %vm1647_vm1, %v3776_v1  ;;  %5557 = vmatpush3.msra.mxu1 %v4869_v17 }
 0xb83   : > { %5564 = vmatprep.mubr.msk.f32.mxu1 %vm1647_vm1, %v3867_v39  ;;  %5558 = vmatprep.subr.mxu1 %v4868_v36 }
 0xb84   : > { %5559 = vmatpush3.msra.mxu1 %v4868_v36  ;;  %5568 = vmatpush3.msra.mxu0 %v3963_v45 }
 0xb85   : > { %5560 = vmatprep.subr.mxu1 %v4867_v40  ;;  %5569 = vmatprep.subr.mxu0 %v3962_v7 }
 0xb86   : > { %5561 = vmatpush3.msra.mxu1 %v4867_v40  ;;  %5570 = vmatpush3.msra.mxu0 %v3962_v7 }
 0xb87   : > { %5562 = vmatprep.subr.mxu1 %v4866_v41  ;;  %5571 = vmatprep.subr.mxu0 %v3961_v46 }
 0xb88   : > { %5563 = vmatpush3.msra.mxu1 %v4866_v41  ;;  %5572 = vmatpush3.msra.mxu0 %v3961_v46 }
 0xb89   : > { %5565 = vmatmul.mubr.msk.f32.vlgmr.msra.gmra.mxu1 %vm1647_vm1, %v3868_v44  ;;  %5573 = vmatprep.subr.mxu0 %v3960_v47 }
 0xb8a   : > { %5574 = vmatpush3.msra.mxu0 %v3960_v47  ;;  %5578 = vmatprep.subr.mxu1 %v4070_v53 }
 0xb8b   : > { %5579 = vmatpush3.msra.mxu1 %v4070_v53  ;;  %5589 = vmatprep.subr.mxu0 %v4881_v54 }
 0xb8c   : > { %5580 = vmatprep.subr.mxu1 %v4069_v55 }
 0xb8d   : > { %5581 = vmatpush3.msra.mxu1 %v4069_v55 }
 0xb8e   : > { %5582 = vmatprep.subr.mxu1 %v4068_v59 }
 0xb8f   : > { %5583 = vmatpush3.msra.mxu1 %v4068_v59 }
 0xb90   : > { %5584 = vmatprep.subr.mxu1 %v4067_v62 }
 0xb91   : > { %5585 = vmatpush3.msra.mxu1 %v4067_v62 }
 0xb92   : > { %5600 = vmatprep.subr.mxu1 %v4887_v3 }
 0xc41   : > { %v5544_v48 = vpop.f32.mrf.mxu1 }
 0xc42   : > { %v3774_v51 = vadd.f32 %v5544_v48, %v4853_v49  ;;  %v5555_v56 = vpop.f32.mrf.mxu0 }
 0xc43   : > { %v3764_v50 = vpop.f32.mrf.mxu1 }
 0xc44   : > { %v3773_v52 = vadd.f32 %v4853_v49, %v3764_v50  ;;  %v3864_v29 = vadd.f32 %v5555_v56, %v3774_v51  ;;  %v3854_v4 = vpop.f32.mrf.mxu0  ;;  %v4892_v51 = vld [vmem:[#allocation19] ss:$0 sm:$0xff] }
 0xc46   : > { %v3863_v6 = vadd.f32 %v3854_v4, %v3773_v52 }
 0xc49   : > { %v5566_v37 = vpop.f32.mrf.mxu1 }
 0xc4a   : > { %v3956_v21 = vadd.f32 %v5566_v37, %v3864_v29  ;;  %v4446_v37 = vcvt.s32.f32 %v6344_v2 }
 0xc4b   : > { %v3946_v30 = vpop.f32.mrf.mxu1 }
 0xc4c   : > { %v3955_v35 = vadd.f32 %v3946_v30, %v3863_v6  ;;  %v3958_v42 = vmax.f32 %v3956_v21, 0.0 }
 0xc4e   : > { %v3957_v38 = vmax.f32 %v3955_v35, 0.0 }
 0xc50   : > { %5575 = vmatprep.mubr.msk.f32.mxu0 %vm1647_vm1, %v3957_v38 }
 0xc51   : > { %5576 = vmatmul.mubr.msk.f32.vlgmr.msra.gmra.mxu0 %vm1647_vm1, %v3958_v42 }
 0xc52   : > { %5590 = vmatpush3.msra.mxu0 %v4881_v54 }
 0xc53   : > { %5591 = vmatprep.subr.mxu0 %v4880_v57 }
 0xc54   : > { %5592 = vmatpush3.msra.mxu0 %v4880_v57 }
 0xc55   : > { %5593 = vmatprep.subr.mxu0 %v4879_v61 }
 0xc56   : > { %5594 = vmatpush3.msra.mxu0 %v4879_v61 }
 0xc57   : > { %5595 = vmatprep.subr.mxu0 %v4878_v63 }
 0xc58   : > { %5596 = vmatpush3.msra.mxu0 %v4878_v63 }
 0xc59   : > { %5611 = vmatprep.subr.mxu0 %v4337_v22 }
 0xd11   : > { %v5577_v60 = vpop.f32.mrf.mxu0 }
 0xd12   : > { %v4050_v8 = vadd.f32 %v5577_v60, %v4872_v5 }
 0xd13   : > { %v4044_v9 = vpop.f32.mrf.mxu0 }
 0xd14   : > { %v4054_v0 = vadd.f32 %v4050_v8, %v6963_v26  ;;  %v4045_v10 = vadd.f32 %v4872_v5, %v4044_v9 }
 0xd16   : > { %4056 = vst.msk [vmem:[#allocation2 + $0xb] sm:$0xff] %vm1647_vm1, %v4054_v0  ;;  %v4053_v11 = vadd.f32 %v4045_v10, %v6965_v28 }
 0xd18   : > { %4055 = vst.msk [vmem:[#allocation2 + $0x3] sm:$0xff] %vm1647_vm1, %v4053_v11 }
 0xd1d   : > { %v4155_v15 = vld [vmem:[#allocation2 + $0xb] sm:$0xff] }
 0xd1e   : > { %v4245_v20 = vld [vmem:[#allocation2 + $0xc] sm:$0xff] }
 0xd1f   : > { %v4065_v12 = vld [vmem:[#allocation2 + $0x2] sm:$0xff]  ;;  %v4066_v14 = vld [vmem:[#allocation2 + $0xa] sm:$0xff] }
 0xd20   : > { %v4154_v13 = vld [vmem:[#allocation2 + $0x3] sm:$0xff]  ;;  %5586 = vmatprep.mubr.msk.f32.mxu1 %vm1647_vm1, %v4065_v12 }
 0xd21   : > { %5597 = vmatprep.mubr.msk.f32.mxu0 %vm1647_vm1, %v4154_v13  ;;  %5587 = vmatmul.mubr.msk.f32.vlgmr.msra.gmra.mxu1 %vm1647_vm1, %v4066_v14  ;;  %v4244_v17 = vld [vmem:[#allocation2 + $0x4] sm:$0xff] }
 0xd22   : > { %5598 = vmatmul.mubr.msk.f32.vlgmr.msra.gmra.mxu0 %vm1647_vm1, %v4155_v15  ;;  %5601 = vmatpush3.msra.mxu1 %v4887_v3 }
 0xd23   : > { %5608 = vmatprep.mubr.msk.f32.mxu1 %vm1647_vm1, %v4244_v17  ;;  %5602 = vmatprep.subr.mxu1 %v4886_v16 }
 0xd24   : > { %5603 = vmatpush3.msra.mxu1 %v4886_v16  ;;  %5612 = vmatpush3.msra.mxu0 %v4337_v22 }
 0xd25   : > { %5604 = vmatprep.subr.mxu1 %v4885_v18 }
 0xd26   : > { %5605 = vmatpush3.msra.mxu1 %v4885_v18 }
 0xd27   : > { %5606 = vmatprep.subr.mxu1 %v4884_v19 }
 0xd28   : > { %5607 = vmatpush3.msra.mxu1 %v4884_v19 }
 0xd29   : > { %5609 = vmatmul.mubr.msk.f32.vlgmr.msra.gmra.mxu1 %vm1647_vm1, %v4245_v20 }
 0xde1   : > { %v5588_v24 = vpop.f32.mrf.mxu1 }
 0xde2   : > { %v4153_v26 = vadd.f32 %v5588_v24, %v4875_v23  ;;  %v5599_v27 = vpop.f32.mrf.mxu0 }
 0xde3   : > { %v4143_v25 = vpop.f32.mrf.mxu1 }
 0xde4   : > { %v4152_v28 = vadd.f32 %v4875_v23, %v4143_v25  ;;  %v4243_v31 = vadd.f32 %v5599_v27, %v4153_v26  ;;  %v4233_v58 = vpop.f32.mrf.mxu0 }
 0xde6   : > { %v4242_v33 = vadd.f32 %v4233_v58, %v4152_v28 }
 0xde9   : > { %v5610_v32 = vpop.f32.mrf.mxu1 }
 0xdea   : > { %v4333_v34 = vadd.f32 %v5610_v32, %v4243_v31 }
 0xdeb   : > { %v4323_v1 = vpop.f32.mrf.mxu1 }
 0xdec   : > { %4336 = vst.msk [vmem:[%s735_s2 + $0x8] sm:$0xff] %vm4334_vm0, %v4333_v34  ;;  %v4332_v36 = vadd.f32 %v4323_v1, %v4242_v33  ;;  %v4420_v41 = vmul.f32 %v4333_v34, %v4333_v34 }
 0xdee   : > { %4335 = vst.msk [vmem:[%s735_s2] sm:$0xff] %vm4334_vm0, %v4332_v36  ;;  %5613 = vmatprep.mubr.msk.f32.mxu0 %vm4334_vm0, %v4332_v36  ;;  %v4419_v39 = vmul.f32 %v4332_v36, %v4332_v36  ;;  %v4424_v43 = vsel %vm4334_vm0, %v4420_v41, 0.0 }
 0xdef   : > { %5614 = vmatmul.mubr.msk.f32.vlgmr.msra.gmra.mxu0 %vm4334_vm0, %v4333_v34 }
 0xdf0   : > { %v4421_v40 = vsel %vm4334_vm0, %v4419_v39, 0.0 }
 0xdf1   : > { %4422 = vadd.xlane.f32.xlu0 %v4421_v40 }
 0xdf5   : > { %4425 = vadd.xlane.f32.xlu0 %v4424_v43 }
 0xe7a   : > { %v4423_v44 = vpop.xlane.xlu0 %4422 }
 0xe7e   : > { %v4426_v48 = vpop.xlane.xlu0 %4425 }
 0xeaf   : > { %v5615_v45 = vpop.f32.mrf.mxu0 }
 0xeb0   : > { %v4428_v7 = vmul.f32 2.0, %v5615_v45 }
 0xeb1   : > { %v4410_v46 = vpop.f32.mrf.mxu0 }
 0xeb2   : > { %v4427_v47 = vmul.f32 2.0, %v4410_v46  ;;  %v4430_v49 = vsub.f32 %v4426_v48, %v4428_v7 }
 0xeb4   : > { %v4429_v50 = vsub.f32 %v4423_v44, %v4427_v47  ;;  %v4439_v29 = vadd.f32 %v4892_v51, %v4430_v49 }
 0xeb6   : > { %v4438_v56 = vadd.f32 %v4892_v51, %v4429_v50  ;;  %v4443_v4 = vsel %vm1647_vm1, %v4439_v29, inf }
 0xeb8   : > { %v4440_v52 = vsel %vm1647_vm1, %v4438_v56, inf }
 0xeb9   : > { %4441 = vmin.xlane.f32.xlu1 %v4440_v52 }
 0xebd   : > { %4444 = vmin.xlane.f32.xlu1 %v4443_v4 }
 0xf42   : > { %v4442_v6 = vpop.xlane.xlu1 %4441 }
 0xf43   : > { %vm4447_vm8 = vcmp.le.f32.partialorder %v4438_v56, %v4442_v6 }
 0xf44   : > { %v4449_v21 = vsel %vm4447_vm8, %v4446_v37, 32.0 }
 0xf45   : > { %v4451_v30 = vsel %vm1647_vm1, %v4449_v21, inf }
 0xf46   : > { %4452 = vmin.xlane.f32.xlu0 %v4451_v30  ;;  %v4445_v35 = vpop.xlane.xlu1 %4444 }
 0xf47   : > { %vm4448_vm9 = vcmp.le.f32.partialorder %v4439_v29, %v4445_v35 }
 0xf48   : > { %v4450_v38 = vsel %vm4448_vm9, %v4446_v37, 32.0 }
 0xf49   : > { %v4454_v42 = vsel %vm1647_vm1, %v4450_v38, inf }
 0xf4a   : > { %4455 = vmin.xlane.f32.xlu1 %v4454_v42 }
 0xfcf   : > { %v4453_v53 = vpop.xlane.xlu0 %4452 }
 0xfd0   : > { %v5617_v54 = vtrunc.f32 %v4453_v53 }
 0xfd2   : > { %v5618_v2 = vcvt.f32.s32 %v5617_v54 }
 0xfd3   : > { %v4456_v55 = vpop.xlane.xlu1 %4455 }
 0xfd4   : > { %4460 = vst.msk [vmem:[%s740_s28] sm:$0xff] %vm4459_vm10, %v5618_v2  ;;  %v5619_v57 = vtrunc.f32 %v4456_v55 }
 0xfd6   : > { %v5620_v59 = vcvt.f32.s32 %v5619_v57 }
 0xfd8   : > { %4461 = vst.msk [vmem:[%s740_s28 + $0x8] sm:$0xff] %vm4459_vm10, %v5620_v59 }
 0xfd9 PF: > { %s7099_s27 = sld [smem:[#allocation26_spill]] }
 0xfdf   : > { %s35_s27 = sadd.s32 1, %s7099_s27  }
 0xfe0   : > { %p32_p4 = scmp.ge.s32.totalorder %s35_s27, 4  }
 0xfe2   :  { %34 = sbr.rel (!%p32_p4) target bundleno = 10 (0xa), region = 199 }
 0xfe7   :  { %4499 = vsyncpa [#allocation4], 1 }
 0xfe8   :  { %4501 = vsyncpa [#allocation4 + $0x1], 1 }
 0xfe9   :  { %4502 = vsyncpa [#allocation6], 1 }
 0xfea   :  { %4503 = vsyncpa [#allocation9], 1 }
 0xfeb   :  { %4504 = vsyncpa [#allocation12], 1 }
 0xfec   :  { %4505 = vsyncpa [#allocation15], 1 }
 0xfed   :  { %4506 = vsyncpa [#allocation18], 1 }

</bundles_post_ra>
